<compile_context>
chip_gen: v5e
topology: v5e:2x2
jax: 0.10.0
libtpu: 0.0.40
codegen_flags: <defaults>
</compile_context>

<pallas_src>
import jax
import jax.numpy as jnp
from jax.experimental import pallas as pl
from jax.experimental.pallas import tpu as pltpu

HIDDEN = 256
EPS = 1e-5


# ---------------------------------------------------------------------------
# Fused kernel: 3 x (Linear [BN folded] -> ReLU), Dropout(eval) = identity.
# Runs once per batch tile; weights/biases are VMEM-resident across tiles.
# ---------------------------------------------------------------------------
def mlpenc_kernel(x_ref, w1_ref, b1_ref, w2_ref, b2_ref, w3_ref, b3_ref,
                  e1_ref, e2_ref, e3_ref):
    # Layer 1
    h1 = jnp.dot(x_ref[...].astype(jnp.bfloat16), w1_ref[...],
                 preferred_element_type=jnp.float32)
    h1 = jnp.maximum(h1 + b1_ref[...], 0.0)
    e1_ref[...] = h1
    # Layer 2 (cast once, reuse for next matmul)
    h1b = h1.astype(jnp.bfloat16)
    h2 = jnp.dot(h1b, w2_ref[...], preferred_element_type=jnp.float32)
    h2 = jnp.maximum(h2 + b2_ref[...], 0.0)
    e2_ref[...] = h2
    # Layer 3
    h2b = h2.astype(jnp.bfloat16)
    h3 = jnp.dot(h2b, w3_ref[...], preferred_element_type=jnp.float32)
    h3 = jnp.maximum(h3 + b3_ref[...], 0.0)
    e3_ref[...] = h3


def _round_up(n, m):
    return ((n + m - 1) // m) * m


def _choose_tile(batch):
    # Large batches: TM=512 (multiple of 256 -> full MXU passes on v6e/v7x,
    # multiple of 128 for v5e) and ~9 MiB of double-buffered per-step VMEM.
    if batch >= 512:
        return 512
    # Tiny batches: a single tile padded to the f32 sublane (8).
    return max(8, _round_up(batch, 8))


# ---------------------------------------------------------------------------
# Forward wrapper: one pallas_call, batch-tiled grid, weights resident.
# ---------------------------------------------------------------------------
@jax.jit
def mlpenc_forward(x, params):
    """Returns (emb, hidden_emb, out_emb) exactly like MLPenc.forward (eval)."""
    B = x.shape[0]
    xf = x.reshape(B, -1).astype(jnp.float32)   # nn.Flatten (row-major C,H,W)
    in_dim = xf.shape[1]
    (w1, b1), (w2, b2), (w3, b3) = params

    tm = _choose_tile(B)
    b_pad = _round_up(B, tm)
    if b_pad != B:
        xf = jnp.pad(xf, ((0, b_pad - B), (0, 0)))
    grid = (b_pad // tm,)

    x_spec = pl.BlockSpec((tm, in_dim), lambda i: (i, 0))
    out_spec = pl.BlockSpec((tm, HIDDEN), lambda i: (i, 0))

    def resident(shape):
        # Full-array block + constant index_map: DMA'd once, stays in VMEM
        # across every batch tile (total weights ~0.75 MiB bf16).
        return pl.BlockSpec(shape, lambda i: (0, 0))

    flops = 2 * b_pad * (in_dim * HIDDEN + 2 * HIDDEN * HIDDEN)
    bytes_accessed = (b_pad * in_dim * 4
                      + sum(w.size * 2 + b.size * 4 for w, b in params)
                      + 3 * b_pad * HIDDEN * 4)

    emb, hidden_emb, out_emb = pl.pallas_call(
        mlpenc_kernel,
        grid=grid,
        in_specs=[x_spec,
                  resident(w1.shape), resident(b1.shape),
                  resident(w2.shape), resident(b2.shape),
                  resident(w3.shape), resident(b3.shape)],
        out_specs=(out_spec, out_spec, out_spec),
        out_shape=(jax.ShapeDtypeStruct((b_pad, HIDDEN), jnp.float32),
                   jax.ShapeDtypeStruct((b_pad, HIDDEN), jnp.float32),
                   jax.ShapeDtypeStruct((b_pad, HIDDEN), jnp.float32)),
        compiler_params=pltpu.CompilerParams(
            dimension_semantics=("parallel",)),
        cost_estimate=pl.CostEstimate(flops=flops, transcendentals=0,
                                      bytes_accessed=bytes_accessed),
    )(xf, w1, b1, w2, b2, w3, b3)

    if b_pad != B:
        emb, hidden_emb, out_emb = emb[:B], hidden_emb[:B], out_emb[:B]
    return emb, hidden_emb, out_emb


# ---------------------------------------------------------------------------
# Parameter construction (deterministic, in-script) with BN folding.
# Weights are stored as [in_features, out_features] so the kernel computes
# y = x @ W + b directly on the MXU.
# ---------------------------------------------------------------------------
def init_mlpenc_params(key, in_dim, hidden=HIDDEN):
    layers = []
    in_dims = [in_dim, hidden, hidden]
    for d_in in in_dims:
        key, kw, kb, kg, kbt, km, kv = jax.random.split(key, 7)
        w = jax.random.normal(kw, (d_in, hidden), jnp.float32) / jnp.sqrt(
            jnp.float32(d_in))
        b = 0.01 * jax.random.normal(kb, (1, hidden), jnp.float32)
        gamma = 1.0 + 0.1 * jax.random.normal(kg, (1, hidden), jnp.float32)
        beta = 0.1 * jax.random.normal(kbt, (1, hidden), jnp.float32)
        run_mean = 0.1 * jax.random.normal(km, (1, hidden), jnp.float32)
        run_var = jnp.abs(
            1.0 + 0.1 * jax.random.normal(kv, (1, hidden), jnp.float32))
        # Fold inference BatchNorm into the Linear (in f32, before bf16 cast):
        #   s = gamma / sqrt(var + eps);  W' = W * s;  b' = (b - mu) * s + beta
        s = gamma * jax.lax.rsqrt(run_var + EPS)          # (1, hidden)
        w_fold = (w * s).astype(jnp.bfloat16)             # bf16 MXU operand
        b_fold = ((b - run_mean) * s + beta).astype(jnp.float32)
        layers.append((w_fold, b_fold))
    return layers


def _reference_forward(x, params):
    """Pure-JAX reference (same folded params, f32 math everywhere)."""
    B = x.shape[0]
    h = x.reshape(B, -1).astype(jnp.float32)
    outs = []
    for w, b in params:
        h = jnp.maximum(h @ w.astype(jnp.float32) + b, 0.0)
        outs.append(h)
    return tuple(outs)


# ---------------------------------------------------------------------------
if __name__ == "__main__":
    B, C, H, W = 2, 4, 16, 16
    in_dim = C * H * W

    key = jax.random.PRNGKey(0)
    kx, kp = jax.random.split(key)

    x = jax.random.normal(kx, (B, C, H, W), jnp.float32)
    params = init_mlpenc_params(kp, in_dim)

    emb, hidden_emb, out_emb = jax.block_until_ready(mlpenc_forward(x, params))

    # sanity on shapes / values
    assert emb.shape == (B, HIDDEN)
    assert hidden_emb.shape == (B, HIDDEN)
    assert out_emb.shape == (B, HIDDEN)
    for t in (emb, hidden_emb, out_emb):
        assert bool(jnp.all(jnp.isfinite(t)))
        assert bool(jnp.all(t >= 0.0))   # ReLU output

    # loose numerical check vs. f32 reference (bf16 MXU operands => ~1e-2 err)
    ref = _reference_forward(x, params)
    for got, want in zip((emb, hidden_emb, out_emb), ref):
        assert bool(jnp.allclose(got, want, rtol=1e-1, atol=1e-1))

    print("KERNEL_OK")
</pallas_src>

<mosaic_0001>
module attributes {stable_mosaic.version = 11 : i64} {
  func.func @mlpenc_kernel(%arg0: i32, %arg1: memref<8x1024xf32, #tpu.memory_space<vmem>>, %arg2: memref<1024x256xbf16, #tpu.memory_space<vmem>>, %arg3: memref<1x256xf32, #tpu.memory_space<vmem>>, %arg4: memref<256x256xbf16, #tpu.memory_space<vmem>>, %arg5: memref<1x256xf32, #tpu.memory_space<vmem>>, %arg6: memref<256x256xbf16, #tpu.memory_space<vmem>>, %arg7: memref<1x256xf32, #tpu.memory_space<vmem>>, %arg8: memref<8x256xf32, #tpu.memory_space<vmem>>, %arg9: memref<8x256xf32, #tpu.memory_space<vmem>>, %arg10: memref<8x256xf32, #tpu.memory_space<vmem>>) attributes {dimension_semantics = [#tpu.dimension_semantics<parallel>], iteration_bounds = array<i64: 1>, scalar_prefetch = 0 : i64, scratch_operands = 0 : i64, tpu.core_type = #tpu.core_type<tc>, window_params = [{transform_indices = @transform_0, window_bounds = array<i64: 8, 1024>}, {pipeline_mode = #tpu.pipeline_mode<synchronous>, transform_indices = @transform_1, window_bounds = array<i64: 1024, 256>}, {pipeline_mode = #tpu.pipeline_mode<synchronous>, transform_indices = @transform_2, window_bounds = array<i64: 1, 256>}, {pipeline_mode = #tpu.pipeline_mode<synchronous>, transform_indices = @transform_3, window_bounds = array<i64: 256, 256>}, {pipeline_mode = #tpu.pipeline_mode<synchronous>, transform_indices = @transform_4, window_bounds = array<i64: 1, 256>}, {pipeline_mode = #tpu.pipeline_mode<synchronous>, transform_indices = @transform_5, window_bounds = array<i64: 256, 256>}, {pipeline_mode = #tpu.pipeline_mode<synchronous>, transform_indices = @transform_6, window_bounds = array<i64: 1, 256>}, {transform_indices = @transform_7, window_bounds = array<i64: 8, 256>}, {transform_indices = @transform_8, window_bounds = array<i64: 8, 256>}, {transform_indices = @transform_9, window_bounds = array<i64: 8, 256>}]} {
    %c0 = arith.constant 0 : index
    %c0_0 = arith.constant 0 : index
    %0 = vector.load %arg1[%c0, %c0_0] : memref<8x1024xf32, #tpu.memory_space<vmem>>, vector<8x1024xf32>
    %1 = arith.truncf %0 : vector<8x1024xf32> to vector<8x1024xbf16>
    %c0_1 = arith.constant 0 : index
    %c0_2 = arith.constant 0 : index
    %2 = vector.load %arg2[%c0_1, %c0_2] : memref<1024x256xbf16, #tpu.memory_space<vmem>>, vector<1024x256xbf16>
    %cst = arith.constant dense<0.000000e+00> : vector<8x256xf32>
    %3 = tpu.matmul %1, %2, %cst {dimension_numbers = #tpu.dot_dimension_numbers<[1], [0], [0], [1], [0, 0, 1, 1], [], []>} : vector<8x1024xbf16>, vector<1024x256xbf16>, vector<8x256xf32> -> vector<8x256xf32>
    %c0_3 = arith.constant 0 : index
    %c0_4 = arith.constant 0 : index
    %4 = vector.load %arg3[%c0_3, %c0_4] : memref<1x256xf32, #tpu.memory_space<vmem>>, vector<1x256xf32>
    %5 = vector.broadcast %4 : vector<1x256xf32> to vector<8x256xf32>
    %6 = arith.addf %3, %5 : vector<8x256xf32>
    %cst_5 = arith.constant 0.000000e+00 : f32
    %7 = vector.broadcast %cst_5 : f32 to vector<8x256xf32>
    %8 = arith.maximumf %6, %7 : vector<8x256xf32>
    %c0_6 = arith.constant 0 : index
    %c0_7 = arith.constant 0 : index
    %9 = vector.load %arg8[%c0_6, %c0_7] : memref<8x256xf32, #tpu.memory_space<vmem>>, vector<8x256xf32>
    tpu.vector_store %arg8[%c0_6, %c0_7], %8 {strides = array<i32>} : memref<8x256xf32, #tpu.memory_space<vmem>>, vector<8x256xf32>,
    %10 = arith.truncf %8 : vector<8x256xf32> to vector<8x256xbf16>
    %c0_8 = arith.constant 0 : index
    %c0_9 = arith.constant 0 : index
    %11 = vector.load %arg4[%c0_8, %c0_9] : memref<256x256xbf16, #tpu.memory_space<vmem>>, vector<256x256xbf16>
    %cst_10 = arith.constant dense<0.000000e+00> : vector<8x256xf32>
    %12 = tpu.matmul %10, %11, %cst_10 {dimension_numbers = #tpu.dot_dimension_numbers<[1], [0], [0], [1], [0, 0, 1, 1], [], []>} : vector<8x256xbf16>, vector<256x256xbf16>, vector<8x256xf32> -> vector<8x256xf32>
    %c0_11 = arith.constant 0 : index
    %c0_12 = arith.constant 0 : index
    %13 = vector.load %arg5[%c0_11, %c0_12] : memref<1x256xf32, #tpu.memory_space<vmem>>, vector<1x256xf32>
    %14 = vector.broadcast %13 : vector<1x256xf32> to vector<8x256xf32>
    %15 = arith.addf %12, %14 : vector<8x256xf32>
    %cst_13 = arith.constant 0.000000e+00 : f32
    %16 = vector.broadcast %cst_13 : f32 to vector<8x256xf32>
    %17 = arith.maximumf %15, %16 : vector<8x256xf32>
    %c0_14 = arith.constant 0 : index
    %c0_15 = arith.constant 0 : index
    %18 = vector.load %arg9[%c0_14, %c0_15] : memref<8x256xf32, #tpu.memory_space<vmem>>, vector<8x256xf32>
    tpu.vector_store %arg9[%c0_14, %c0_15], %17 {strides = array<i32>} : memref<8x256xf32, #tpu.memory_space<vmem>>, vector<8x256xf32>,
    %19 = arith.truncf %17 : vector<8x256xf32> to vector<8x256xbf16>
    %c0_16 = arith.constant 0 : index
    %c0_17 = arith.constant 0 : index
    %20 = vector.load %arg6[%c0_16, %c0_17] : memref<256x256xbf16, #tpu.memory_space<vmem>>, vector<256x256xbf16>
    %cst_18 = arith.constant dense<0.000000e+00> : vector<8x256xf32>
    %21 = tpu.matmul %19, %20, %cst_18 {dimension_numbers = #tpu.dot_dimension_numbers<[1], [0], [0], [1], [0, 0, 1, 1], [], []>} : vector<8x256xbf16>, vector<256x256xbf16>, vector<8x256xf32> -> vector<8x256xf32>
    %c0_19 = arith.constant 0 : index
    %c0_20 = arith.constant 0 : index
    %22 = vector.load %arg7[%c0_19, %c0_20] : memref<1x256xf32, #tpu.memory_space<vmem>>, vector<1x256xf32>
    %23 = vector.broadcast %22 : vector<1x256xf32> to vector<8x256xf32>
    %24 = arith.addf %21, %23 : vector<8x256xf32>
    %cst_21 = arith.constant 0.000000e+00 : f32
    %25 = vector.broadcast %cst_21 : f32 to vector<8x256xf32>
    %26 = arith.maximumf %24, %25 : vector<8x256xf32>
    %c0_22 = arith.constant 0 : index
    %c0_23 = arith.constant 0 : index
    %27 = vector.load %arg10[%c0_22, %c0_23] : memref<8x256xf32, #tpu.memory_space<vmem>>, vector<8x256xf32>
    tpu.vector_store %arg10[%c0_22, %c0_23], %26 {strides = array<i32>} : memref<8x256xf32, #tpu.memory_space<vmem>>, vector<8x256xf32>,
    return
  }
  func.func @transform_0(%arg0: i32) -> (i32, i32) {
    %c0_i32 = arith.constant 0 : i32
    %c0_i32_0 = arith.constant 0 : i32
    return %arg0, %c0_i32 : i32, i32
  }
  func.func @transform_1(%arg0: i32) -> (i32, i32) {
    %c0_i32 = arith.constant 0 : i32
    %c0_i32_0 = arith.constant 0 : i32
    %c0_i32_1 = arith.constant 0 : i32
    return %c0_i32, %c0_i32_0 : i32, i32
  }
  func.func @transform_2(%arg0: i32) -> (i32, i32) {
    %c0_i32 = arith.constant 0 : i32
    %c0_i32_0 = arith.constant 0 : i32
    %c0_i32_1 = arith.constant 0 : i32
    return %c0_i32, %c0_i32_0 : i32, i32
  }
  func.func @transform_3(%arg0: i32) -> (i32, i32) {
    %c0_i32 = arith.constant 0 : i32
    %c0_i32_0 = arith.constant 0 : i32
    %c0_i32_1 = arith.constant 0 : i32
    return %c0_i32, %c0_i32_0 : i32, i32
  }
  func.func @transform_4(%arg0: i32) -> (i32, i32) {
    %c0_i32 = arith.constant 0 : i32
    %c0_i32_0 = arith.constant 0 : i32
    %c0_i32_1 = arith.constant 0 : i32
    return %c0_i32, %c0_i32_0 : i32, i32
  }
  func.func @transform_5(%arg0: i32) -> (i32, i32) {
    %c0_i32 = arith.constant 0 : i32
    %c0_i32_0 = arith.constant 0 : i32
    %c0_i32_1 = arith.constant 0 : i32
    return %c0_i32, %c0_i32_0 : i32, i32
  }
  func.func @transform_6(%arg0: i32) -> (i32, i32) {
    %c0_i32 = arith.constant 0 : i32
    %c0_i32_0 = arith.constant 0 : i32
    %c0_i32_1 = arith.constant 0 : i32
    return %c0_i32, %c0_i32_0 : i32, i32
  }
  func.func @transform_7(%arg0: i32) -> (i32, i32) {
    %c0_i32 = arith.constant 0 : i32
    %c0_i32_0 = arith.constant 0 : i32
    return %arg0, %c0_i32 : i32, i32
  }
  func.func @transform_8(%arg0: i32) -> (i32, i32) {
    %c0_i32 = arith.constant 0 : i32
    %c0_i32_0 = arith.constant 0 : i32
    return %arg0, %c0_i32 : i32, i32
  }
  func.func @transform_9(%arg0: i32) -> (i32, i32) {
    %c0_i32 = arith.constant 0 : i32
    %c0_i32_0 = arith.constant 0 : i32
    return %arg0, %c0_i32 : i32, i32
  }
}

</mosaic_0001>

<bundles_post_ra>
// kernel: mlpenc_forward.1
= control target key start
LH: loop header
LB: loop body
LE: loop exit
PB: predicated region body
PF: predicated region fallthrough
CT: control target
= control target key end

     0   :  { %15 = vsyncpa [#allocation3], 0  ;;  %s2796_s0 = inlined_call_operand.vmem [shape: f32[8,1024], index: 0, kind: input, shape index: {}]   ;;  %s2797_s1 = inlined_call_operand.hbm [shape: bf16[1024,256], index: 1, kind: input, shape index: {}]   ;;  %s2798_s2 = inlined_call_operand.vmem [shape: f32[1,256], index: 2, kind: input, shape index: {}]   ;;  %s2799_s3 = inlined_call_operand.hbm [shape: bf16[256,256], index: 3, kind: input, shape index: {}]   ;;  %s2800_s4 = inlined_call_operand.vmem [shape: f32[1,256], index: 4, kind: input, shape index: {}]   ;;  %s2801_s5 = inlined_call_operand.hbm [shape: bf16[256,256], index: 5, kind: input, shape index: {}]   ;;  %s2802_s6 = inlined_call_operand.vmem [shape: f32[1,256], index: 6, kind: input, shape index: {}]   ;;  %s2803_s7 = inlined_call_operand.vmem [shape: f32[8,256], index: 7, kind: output, shape index: {0}]   ;;  %s2804_s8 = inlined_call_operand.vmem [shape: f32[8,256], index: 8, kind: output, shape index: {1}]   ;;  %s2805_s9 = inlined_call_operand.vmem [shape: f32[8,256], index: 9, kind: output, shape index: {2}]  }
   0x1   :  { %16 = vsyncpa [#allocation5], 0  ;;  %s38_s11 = sshll.u32 %s2799_s3, 4  ;;  %s2645_s12 = smov [#allocation4]   ;;  %s39_s11 = int_to_ptr.hbm [resolvable:$true] %s38_s11 }
   0x2   :  { %s40_s13 = sshll.u32 %s2645_s12, 4  ;;  %s23_s16 = sshll.u32 %s2797_s1, 4  ;;  %s41_s13 = int_to_ptr.vmem [resolvable:$true] %s40_s13  ;;  %s24_s16 = int_to_ptr.hbm [resolvable:$true] %s23_s16 }
   0x3   :  { %s2646_s17 = smov 128   ;;  %s2647_s18 = smov 8  }
   0x4   :  { %46 = dma.hbm_to_vmem [thread:$0]  %s39_s11, 4096, %s41_s13, [#allocation5], %s2646_s17, %s2646_s17, %s2647_s18  }
   0x5   :  { %s2648_s19 = smov [#allocation2]   ;;  %s53_s23 = sshll.u32 %s2801_s5, 4  ;;  %s54_s23 = int_to_ptr.hbm [resolvable:$true] %s53_s23 }
   0x6   :  { %s25_s20 = sshll.u32 %s2648_s19, 4  ;;  %s2649_s3 = smov [#allocation6]   ;;  %s26_s20 = int_to_ptr.vmem [resolvable:$true] %s25_s20 }
   0x7   :  { %31 = dma.hbm_to_vmem [thread:$0]  %s24_s16, 16384, %s26_s20, [#allocation3], %s2646_s17, %s2646_s17, %s2647_s18  }
   0x8   :  { %s55_s24 = sshll.u32 %s2649_s3, 4  ;;  %s56_s24 = int_to_ptr.vmem [resolvable:$true] %s55_s24 }
   0x9   :  { %61 = dma.hbm_to_vmem [thread:$0]  %s54_s23, 4096, %s56_s24, [#allocation5], %s2646_s17, %s2646_s17, %s2647_s18  }
   0xa   :  { %2641 = dma.done.wait [#allocation3], 16384  }
   0xb   :  { %2642 = vsyncadd [#allocation3], 4294950912 }
   0xc   :  { %2643 = dma.done.wait [#allocation5], 8192  }
   0xd   :  { %2644 = vsyncadd [#allocation5], 4294959104  ;;  %v1662_v0 = vld [vmem:[#allocation2 + $0x70] sm:$0xf]  ;;  %v2387_v1 = vld [vmem:[#allocation2 + $0x74] sm:$0xf0] }
   0xe   :  { %v1726_v2 = vld [vmem:[#allocation2 + $0xf0] sm:$0xf]  ;;  %v1663_v3 = vor.u32 %v2387_v1, %v1662_v0  ;;  %v2403_v4 = vld [vmem:[#allocation2 + $0xf4] sm:$0xf0]  ;;  %v1654_v11 = vld [vmem:[#allocation2 + $0x60] sm:$0xf] }
   0xf   :  { %v1790_v5 = vld [vmem:[#allocation2 + $0x170] sm:$0xf]  ;;  %v2419_v6 = vld [vmem:[#allocation2 + $0x174] sm:$0xf0]  ;;  %v1727_v7 = vor.u32 %v2403_v4, %v1726_v2  ;;  %v2385_v13 = vld [vmem:[#allocation2 + $0x64] sm:$0xf0] }
  0x10   :  { %v1791_v8 = vor.u32 %v2419_v6, %v1790_v5  ;;  %v1854_v9 = vld [vmem:[#allocation2 + $0x1f0] sm:$0xf]  ;;  %v2435_v10 = vld [vmem:[#allocation2 + $0x1f4] sm:$0xf0]  ;;  %866 = vmatpush.bf16.msra.mxu0 %v1663_v3  ;;  %v1718_v14 = vld [vmem:[#allocation2 + $0xe0] sm:$0xf]  ;;  %v1655_v16 = vor.u32 %v2385_v13, %v1654_v11 }
  0x11   :  { %v1855_v12 = vor.u32 %v2435_v10, %v1854_v9  ;;  %v2401_v15 = vld [vmem:[#allocation2 + $0xe4] sm:$0xf0]  ;;  %879 = vmatpush.bf16.msra.mxu1 %v1727_v7  ;;  %v1782_v18 = vld [vmem:[#allocation2 + $0x160] sm:$0xf]  ;;  %v1646_v23 = vld [vmem:[#allocation2 + $0x50] sm:$0xf] }
  0x12   :  { %892 = vmatpush.bf16.msra.mxu2 %v1791_v8  ;;  %v1719_v17 = vor.u32 %v2401_v15, %v1718_v14  ;;  %v2417_v19 = vld [vmem:[#allocation2 + $0x164] sm:$0xf0]  ;;  %v1846_v20 = vld [vmem:[#allocation2 + $0x1e0] sm:$0xf]  ;;  %v2383_v24 = vld [vmem:[#allocation2 + $0x54] sm:$0xf0] }
  0x13   :  { %905 = vmatpush.bf16.msra.mxu3 %v1855_v12  ;;  %v1783_v21 = vor.u32 %v2417_v19, %v1782_v18  ;;  %v2433_v22 = vld [vmem:[#allocation2 + $0x1e4] sm:$0xf0]  ;;  %v1710_v26 = vld [vmem:[#allocation2 + $0xd0] sm:$0xf]  ;;  %v2399_v27 = vld [vmem:[#allocation2 + $0xd4] sm:$0xf0]  ;;  %v1647_v29 = vor.u32 %v2383_v24, %v1646_v23 }
  0x14   :  { %v1847_v25 = vor.u32 %v2433_v22, %v1846_v20  ;;  %v1774_v28 = vld [vmem:[#allocation2 + $0x150] sm:$0xf]  ;;  %867 = vmatpush.bf16.msra.mxu0 %v1655_v16  ;;  %v2415_v30 = vld [vmem:[#allocation2 + $0x154] sm:$0xf0]  ;;  %v1711_v33 = vor.u32 %v2399_v27, %v1710_v26  ;;  %v1638_v35 = vld [vmem:[#allocation2 + $0x40] sm:$0xf] }
  0x15   :  { %v1838_v31 = vld [vmem:[#allocation2 + $0x1d0] sm:$0xf]  ;;  %v2431_v32 = vld [vmem:[#allocation2 + $0x1d4] sm:$0xf0]  ;;  %880 = vmatpush.bf16.msra.mxu1 %v1719_v17  ;;  %v1775_v34 = vor.u32 %v2415_v30, %v1774_v28  ;;  %v2381_v36 = vld [vmem:[#allocation2 + $0x44] sm:$0xf0] }
  0x16   :  { %893 = vmatpush.bf16.msra.mxu2 %v1783_v21  ;;  %v1702_v37 = vld [vmem:[#allocation2 + $0xc0] sm:$0xf]  ;;  %v1839_v38 = vor.u32 %v2431_v32, %v1838_v31  ;;  %v2397_v39 = vld [vmem:[#allocation2 + $0xc4] sm:$0xf0]  ;;  %v1639_v44 = vor.u32 %v2381_v36, %v1638_v35  ;;  %v1630_v47 = vld [vmem:[#allocation2 + $0x30] sm:$0xf] }
  0x17   :  { %906 = vmatpush.bf16.msra.mxu3 %v1847_v25  ;;  %v1766_v40 = vld [vmem:[#allocation2 + $0x140] sm:$0xf]  ;;  %v2413_v41 = vld [vmem:[#allocation2 + $0x144] sm:$0xf0]  ;;  %v1703_v45 = vor.u32 %v2397_v39, %v1702_v37  ;;  %v2379_v48 = vld [vmem:[#allocation2 + $0x34] sm:$0xf0] }
  0x18   :  { %v1830_v42 = vld [vmem:[#allocation2 + $0x1c0] sm:$0xf]  ;;  %v2429_v43 = vld [vmem:[#allocation2 + $0x1c4] sm:$0xf0]  ;;  %868 = vmatpush.bf16.msra.mxu0 %v1647_v29  ;;  %v1767_v46 = vor.u32 %v2413_v41, %v1766_v40  ;;  %v1694_v49 = vld [vmem:[#allocation2 + $0xb0] sm:$0xf]  ;;  %v1631_v56 = vor.u32 %v2379_v48, %v1630_v47 }
  0x19   :  { %881 = vmatpush.bf16.msra.mxu1 %v1711_v33  ;;  %v1831_v50 = vor.u32 %v2429_v43, %v1830_v42  ;;  %v2395_v51 = vld [vmem:[#allocation2 + $0xb4] sm:$0xf0]  ;;  %v1758_v52 = vld [vmem:[#allocation2 + $0x130] sm:$0xf]  ;;  %v1622_v59 = vld [vmem:[#allocation2 + $0x20] sm:$0xf] }
  0x1a   :  { %894 = vmatpush.bf16.msra.mxu2 %v1775_v34  ;;  %v2411_v53 = vld [vmem:[#allocation2 + $0x134] sm:$0xf0]  ;;  %v1822_v54 = vld [vmem:[#allocation2 + $0x1b0] sm:$0xf]  ;;  %v1695_v57 = vor.u32 %v2395_v51, %v1694_v49  ;;  %v2377_v60 = vld [vmem:[#allocation2 + $0x24] sm:$0xf0] }
  0x1b   :  { %907 = vmatpush.bf16.msra.mxu3 %v1839_v38  ;;  %v2427_v55 = vld [vmem:[#allocation2 + $0x1b4] sm:$0xf0]  ;;  %v1759_v58 = vor.u32 %v2411_v53, %v1758_v52  ;;  %v1686_v61 = vld [vmem:[#allocation2 + $0xa0] sm:$0xf]  ;;  %v2393_v63 = vld [vmem:[#allocation2 + $0xa4] sm:$0xf0]  ;;  %v1623_v4 = vor.u32 %v2377_v60, %v1622_v59 }
  0x1c   :  { %869 = vmatpush.bf16.msra.mxu0 %v1639_v44  ;;  %v1823_v62 = vor.u32 %v2427_v55, %v1822_v54  ;;  %v1750_v0 = vld [vmem:[#allocation2 + $0x120] sm:$0xf]  ;;  %v2409_v1 = vld [vmem:[#allocation2 + $0x124] sm:$0xf0]  ;;  %v1687_v5 = vor.u32 %v2393_v63, %v1686_v61  ;;  %v1614_v7 = vld [vmem:[#allocation2 + $0x10] sm:$0xf] }
  0x1d   :  { %882 = vmatpush.bf16.msra.mxu1 %v1703_v45  ;;  %v1814_v2 = vld [vmem:[#allocation2 + $0x1a0] sm:$0xf]  ;;  %v2425_v3 = vld [vmem:[#allocation2 + $0x1a4] sm:$0xf0]  ;;  %v1751_v6 = vor.u32 %v2409_v1, %v1750_v0  ;;  %v2375_v8 = vld [vmem:[#allocation2 + $0x14] sm:$0xf0] }
  0x1e   :  { %895 = vmatpush.bf16.msra.mxu2 %v1767_v46  ;;  %v1678_v9 = vld [vmem:[#allocation2 + $0x90] sm:$0xf]  ;;  %v1815_v10 = vor.u32 %v2425_v3, %v1814_v2  ;;  %v2391_v11 = vld [vmem:[#allocation2 + $0x94] sm:$0xf0]  ;;  %v1615_v16 = vor.u32 %v2375_v8, %v1614_v7  ;;  %v1606_v17 = vld [vmem:[#allocation2] sm:$0xf] }
  0x1f   :  { %908 = vmatpush.bf16.msra.mxu3 %v1831_v50  ;;  %v1742_v12 = vld [vmem:[#allocation2 + $0x110] sm:$0xf]  ;;  %v2407_v13 = vld [vmem:[#allocation2 + $0x114] sm:$0xf0]  ;;  %v2373_v18 = vld [vmem:[#allocation2 + $0x4] sm:$0xf0]  ;;  %v1679_v19 = vor.u32 %v2391_v11, %v1678_v9 }
  0x20   :  { %870 = vmatpush.bf16.msra.mxu0 %v1631_v56  ;;  %v1806_v14 = vld [vmem:[#allocation2 + $0x190] sm:$0xf]  ;;  %v2423_v15 = vld [vmem:[#allocation2 + $0x194] sm:$0xf0]  ;;  %v1743_v20 = vor.u32 %v2407_v13, %v1742_v12  ;;  %v1670_v21 = vld [vmem:[#allocation2 + $0x80] sm:$0xf]  ;;  %v1607_v31 = vor.u32 %v2373_v18, %v1606_v17 }
  0x21   :  { %883 = vmatpush.bf16.msra.mxu1 %v1695_v57  ;;  %v2389_v22 = vld [vmem:[#allocation2 + $0x84] sm:$0xf0]  ;;  %v1734_v23 = vld [vmem:[#allocation2 + $0x100] sm:$0xf]  ;;  %v1807_v24 = vor.u32 %v2423_v15, %v1806_v14  ;;  %v1918_v28 = vld [vmem:[#allocation2 + $0x270] sm:$0xf] }
  0x22   :  { %896 = vmatpush.bf16.msra.mxu2 %v1759_v58  ;;  %v2405_v25 = vld [vmem:[#allocation2 + $0x104] sm:$0xf0]  ;;  %v1798_v26 = vld [vmem:[#allocation2 + $0x180] sm:$0xf]  ;;  %v2451_v29 = vld [vmem:[#allocation2 + $0x274] sm:$0xf0]  ;;  %v1671_v35 = vor.u32 %v2389_v22, %v1670_v21 }
  0x23   :  { %909 = vmatpush.bf16.msra.mxu3 %v1823_v62  ;;  %v2421_v27 = vld [vmem:[#allocation2 + $0x184] sm:$0xf0]  ;;  %v1982_v30 = vld [vmem:[#allocation2 + $0x2f0] sm:$0xf]  ;;  %v2467_v32 = vld [vmem:[#allocation2 + $0x2f4] sm:$0xf0]  ;;  %v1735_v36 = vor.u32 %v2405_v25, %v1734_v23  ;;  %v1919_v40 = vor.u32 %v2451_v29, %v1918_v28 }
  0x24   :  { %871 = vmatpush.bf16.msra.mxu0 %v1623_v4  ;;  %v2046_v33 = vld [vmem:[#allocation2 + $0x370] sm:$0xf]  ;;  %v2483_v34 = vld [vmem:[#allocation2 + $0x374] sm:$0xf0]  ;;  %v1799_v39 = vor.u32 %v2421_v27, %v1798_v26  ;;  %v1983_v41 = vor.u32 %v2467_v32, %v1982_v30  ;;  %v1910_v43 = vld [vmem:[#allocation2 + $0x260] sm:$0xf] }
  0x25   :  { %884 = vmatpush.bf16.msra.mxu1 %v1687_v5  ;;  %v2110_v37 = vld [vmem:[#allocation2 + $0x3f0] sm:$0xf]  ;;  %v2499_v38 = vld [vmem:[#allocation2 + $0x3f4] sm:$0xf0]  ;;  %v2047_v42 = vor.u32 %v2483_v34, %v2046_v33  ;;  %v2449_v44 = vld [vmem:[#allocation2 + $0x264] sm:$0xf0] }
  0x26   :  { %897 = vmatpush.bf16.msra.mxu2 %v1751_v6  ;;  %v1974_v45 = vld [vmem:[#allocation2 + $0x2e0] sm:$0xf]  ;;  %v2111_v46 = vor.u32 %v2499_v38, %v2110_v37  ;;  %v2465_v47 = vld [vmem:[#allocation2 + $0x2e4] sm:$0xf0]  ;;  %v78_v52 = vld [vmem:[%s2796_s0 + $0x10] sm:$0xff]  ;;  %v1911_v53 = vor.u32 %v2449_v44, %v1910_v43 }
  0x27   :  { %910 = vmatpush.bf16.msra.mxu3 %v1815_v10  ;;  %v2038_v48 = vld [vmem:[#allocation2 + $0x360] sm:$0xf]  ;;  %v2481_v49 = vld [vmem:[#allocation2 + $0x364] sm:$0xf0]  ;;  %v1902_v54 = vld [vmem:[#allocation2 + $0x250] sm:$0xf]  ;;  %v2712_v57 = vpack.c.bf16 %v78_v52, %v78_v52  ;;  %v1975_v58 = vor.u32 %v2465_v47, %v1974_v45 }
  0x28   :  { %872 = vmatpush.bf16.msra.mxu0 %v1615_v16  ;;  %v2102_v50 = vld [vmem:[#allocation2 + $0x3e0] sm:$0xf]  ;;  %v2497_v51 = vld [vmem:[#allocation2 + $0x3e4] sm:$0xf0]  ;;  %v2447_v55 = vld [vmem:[#allocation2 + $0x254] sm:$0xf0]  ;;  %v2039_v59 = vor.u32 %v2481_v49, %v2038_v48 }
  0x29   :  { %885 = vmatpush.bf16.msra.mxu1 %v1679_v19  ;;  %v1966_v56 = vld [vmem:[#allocation2 + $0x2d0] sm:$0xf]  ;;  %v2463_v60 = vld [vmem:[#allocation2 + $0x2d4] sm:$0xf0]  ;;  %v2103_v63 = vor.u32 %v2497_v51, %v2102_v50  ;;  %v76_v0 = vld [vmem:[%s2796_s0] sm:$0xff]  ;;  %v1903_v8 = vor.u32 %v2447_v55, %v1902_v54 }
  0x2a   :  { %898 = vmatpush.bf16.msra.mxu2 %v1743_v20  ;;  %v2030_v61 = vld [vmem:[#allocation2 + $0x350] sm:$0xf]  ;;  %v2479_v62 = vld [vmem:[#allocation2 + $0x354] sm:$0xf0]  ;;  %v77_v2 = vld [vmem:[%s2796_s0 + $0x8] sm:$0xff]  ;;  %v2724_v5 = vpack.c.bf16 %v76_v0, %v76_v0  ;;  %v1967_v9 = vor.u32 %v2463_v60, %v1966_v56 }
  0x2b   :  { %911 = vmatpush.bf16.msra.mxu3 %v1807_v24  ;;  %v79_v1 = vld [vmem:[%s2796_s0 + $0x18] sm:$0xff]  ;;  %v2094_v3 = vld [vmem:[#allocation2 + $0x3d0] sm:$0xf]  ;;  %v2728_v7 = vpack.c.bf16 %v77_v2, %v77_v2  ;;  %v2031_v10 = vor.u32 %v2479_v62, %v2030_v61  ;;  %v1894_v11 = vld [vmem:[#allocation2 + $0x240] sm:$0xf] }
  0x2c   :  { %873 = vmatpush.bf16.msra.mxu0 %v1607_v31  ;;  %v2495_v4 = vld [vmem:[#allocation2 + $0x3d4] sm:$0xf0]  ;;  %v2726_v6 = vpack.c.bf16 %v79_v1, %v79_v1  ;;  %v2445_v12 = vld [vmem:[#allocation2 + $0x244] sm:$0xf0]  ;;  %v1958_v13 = vld [vmem:[#allocation2 + $0x2c0] sm:$0xf] }
  0x2d   :  { %886 = vmatpush.bf16.msra.mxu1 %v1671_v35  ;;  %v2095_v14 = vor.u32 %v2495_v4, %v2094_v3  ;;  %v2461_v15 = vld [vmem:[#allocation2 + $0x2c4] sm:$0xf0]  ;;  %v2022_v16 = vld [vmem:[#allocation2 + $0x340] sm:$0xf]  ;;  %v1895_v20 = vor.u32 %v2445_v12, %v1894_v11  ;;  %v1886_v23 = vld [vmem:[#allocation2 + $0x230] sm:$0xf] }
  0x2e   :  { %899 = vmatpush.bf16.msra.mxu2 %v1735_v36  ;;  %v2477_v17 = vld [vmem:[#allocation2 + $0x344] sm:$0xf0]  ;;  %v2086_v18 = vld [vmem:[#allocation2 + $0x3c0] sm:$0xf]  ;;  %v1959_v21 = vor.u32 %v2461_v15, %v1958_v13  ;;  %v2443_v24 = vld [vmem:[#allocation2 + $0x234] sm:$0xf0] }
  0x2f   :  { %912 = vmatpush.bf16.msra.mxu3 %v1799_v39  ;;  %874 = vmatmul.bf16.vlgmr.msra.gmra.mxu0 %v2724_v5  ;;  %v2493_v19 = vld [vmem:[#allocation2 + $0x3c4] sm:$0xf0]  ;;  %v2023_v22 = vor.u32 %v2477_v17, %v2022_v16  ;;  %v1950_v25 = vld [vmem:[#allocation2 + $0x2b0] sm:$0xf]  ;;  %v2459_v27 = vld [vmem:[#allocation2 + $0x2b4] sm:$0xf0]  ;;  %v1887_v32 = vor.u32 %v2443_v24, %v1886_v23 }
  0x30   :  { %918 = vmatpush.bf16.msrb.mxu0 %v1919_v40  ;;  %887 = vmatmul.bf16.vlgmr.msra.gmra.mxu1 %v2728_v7  ;;  %v2087_v26 = vor.u32 %v2493_v19, %v2086_v18  ;;  %v2014_v28 = vld [vmem:[#allocation2 + $0x330] sm:$0xf]  ;;  %v2475_v29 = vld [vmem:[#allocation2 + $0x334] sm:$0xf0]  ;;  %v1951_v33 = vor.u32 %v2459_v27, %v1950_v25  ;;  %v1878_v35 = vld [vmem:[#allocation2 + $0x220] sm:$0xf] }
  0x31   :  { %931 = vmatpush.bf16.msrb.mxu1 %v1983_v41  ;;  %900 = vmatmul.bf16.vlgmr.msra.gmra.mxu2 %v2712_v57  ;;  %v2078_v30 = vld [vmem:[#allocation2 + $0x3b0] sm:$0xf]  ;;  %v2491_v31 = vld [vmem:[#allocation2 + $0x3b4] sm:$0xf0]  ;;  %v2015_v34 = vor.u32 %v2475_v29, %v2014_v28  ;;  %v2441_v36 = vld [vmem:[#allocation2 + $0x224] sm:$0xf0] }
  0x32   :  { %944 = vmatpush.bf16.msrb.mxu2 %v2047_v42  ;;  %913 = vmatmul.bf16.vlgmr.msra.gmra.mxu3 %v2726_v6  ;;  %v1942_v37 = vld [vmem:[#allocation2 + $0x2a0] sm:$0xf]  ;;  %v2079_v38 = vor.u32 %v2491_v31, %v2078_v30  ;;  %v2457_v39 = vld [vmem:[#allocation2 + $0x2a4] sm:$0xf0]  ;;  %v1879_v44 = vor.u32 %v2441_v36, %v1878_v35  ;;  %v1870_v47 = vld [vmem:[#allocation2 + $0x210] sm:$0xf] }
  0x33   :  { %957 = vmatpush.bf16.msrb.mxu3 %v2111_v46  ;;  %v2006_v40 = vld [vmem:[#allocation2 + $0x320] sm:$0xf]  ;;  %v2473_v41 = vld [vmem:[#allocation2 + $0x324] sm:$0xf0]  ;;  %v1943_v45 = vor.u32 %v2457_v39, %v1942_v37  ;;  %v2439_v48 = vld [vmem:[#allocation2 + $0x214] sm:$0xf0] }
  0x34   :  { %919 = vmatpush.bf16.msrb.mxu0 %v1911_v53  ;;  %v2070_v42 = vld [vmem:[#allocation2 + $0x3a0] sm:$0xf]  ;;  %v2489_v43 = vld [vmem:[#allocation2 + $0x3a4] sm:$0xf0]  ;;  %v2007_v46 = vor.u32 %v2473_v41, %v2006_v40  ;;  %v1934_v49 = vld [vmem:[#allocation2 + $0x290] sm:$0xf]  ;;  %v1871_v56 = vor.u32 %v2439_v48, %v1870_v47 }
  0x35   :  { %932 = vmatpush.bf16.msrb.mxu1 %v1975_v58  ;;  %v2071_v50 = vor.u32 %v2489_v43, %v2070_v42  ;;  %v2455_v51 = vld [vmem:[#allocation2 + $0x294] sm:$0xf0]  ;;  %v1998_v52 = vld [vmem:[#allocation2 + $0x310] sm:$0xf]  ;;  %v1862_v58 = vld [vmem:[#allocation2 + $0x200] sm:$0xf] }
  0x36   :  { %945 = vmatpush.bf16.msrb.mxu2 %v2039_v59  ;;  %v2471_v53 = vld [vmem:[#allocation2 + $0x314] sm:$0xf0]  ;;  %v2062_v54 = vld [vmem:[#allocation2 + $0x390] sm:$0xf]  ;;  %v2437_v59 = vld [vmem:[#allocation2 + $0x204] sm:$0xf0]  ;;  %v1935_v60 = vor.u32 %v2455_v51, %v1934_v49 }
  0x37   :  { %958 = vmatpush.bf16.msrb.mxu3 %v2103_v63  ;;  %v2487_v55 = vld [vmem:[#allocation2 + $0x394] sm:$0xf0]  ;;  %v1999_v61 = vor.u32 %v2471_v53, %v1998_v52  ;;  %v1926_v62 = vld [vmem:[#allocation2 + $0x280] sm:$0xf]  ;;  %v2453_v63 = vld [vmem:[#allocation2 + $0x284] sm:$0xf0]  ;;  %v1863_v11 = vor.u32 %v2437_v59, %v1862_v58 }
  0x38   :  { %920 = vmatpush.bf16.msrb.mxu0 %v1903_v8  ;;  %v1990_v0 = vld [vmem:[#allocation2 + $0x300] sm:$0xf]  ;;  %v2063_v1 = vor.u32 %v2487_v55, %v2062_v54  ;;  %v2469_v2 = vld [vmem:[#allocation2 + $0x304] sm:$0xf0]  ;;  %v2386_v8 = vld [vmem:[#allocation2 + $0x74] sm:$0xf]  ;;  %v1927_v15 = vor.u32 %v2453_v63, %v1926_v62 }
  0x39   :  { %933 = vmatpush.bf16.msrb.mxu1 %v1967_v9  ;;  %v2054_v3 = vld [vmem:[#allocation2 + $0x380] sm:$0xf]  ;;  %v2485_v4 = vld [vmem:[#allocation2 + $0x384] sm:$0xf0]  ;;  %v1664_v9 = vld [vmem:[#allocation2 + $0x78] sm:$0xf0]  ;;  %v1991_v16 = vor.u32 %v2469_v2, %v1990_v0 }
  0x3a   :  { %946 = vmatpush.bf16.msrb.mxu2 %v2031_v10  ;;  %v2402_v10 = vld [vmem:[#allocation2 + $0xf4] sm:$0xf]  ;;  %v1728_v12 = vld [vmem:[#allocation2 + $0xf8] sm:$0xf0]  ;;  %v2384_v24 = vld [vmem:[#allocation2 + $0x64] sm:$0xf] }
  0x3b   :  { %959 = vmatpush.bf16.msrb.mxu3 %v2095_v14  ;;  %v2418_v13 = vld [vmem:[#allocation2 + $0x174] sm:$0xf]  ;;  %v1792_v14 = vld [vmem:[#allocation2 + $0x178] sm:$0xf0]  ;;  %v1731_v25 = vor.u32 %v2402_v10, %v1728_v12  ;;  %v1656_v27 = vld [vmem:[#allocation2 + $0x68] sm:$0xf0] }
  0x3c   :  { %921 = vmatpush.bf16.msrb.mxu0 %v1895_v20  ;;  %v2434_v17 = vld [vmem:[#allocation2 + $0x1f4] sm:$0xf]  ;;  %v1856_v18 = vld [vmem:[#allocation2 + $0x1f8] sm:$0xf0]  ;;  %v2055_v20 = vor.u32 %v2485_v4, %v2054_v3  ;;  %v2400_v28 = vld [vmem:[#allocation2 + $0xe4] sm:$0xf]  ;;  %v1659_v39 = vor.u32 %v2384_v24, %v1656_v27 }
  0x3d   :  { %934 = vmatpush.bf16.msrb.mxu1 %v1959_v21  ;;  %v82_v19 = vld [vmem:[%s2796_s0 + $0x30] sm:$0xff]  ;;  %v1667_v21 = vor.u32 %v2386_v8, %v1664_v9  ;;  %v83_v23 = vld [vmem:[%s2796_s0 + $0x38] sm:$0xff]  ;;  %v81_v29 = vld [vmem:[%s2796_s0 + $0x28] sm:$0xff]  ;;  %v1859_v30 = vor.u32 %v2434_v17, %v1856_v18 }
  0x3e   :  { %947 = vmatpush.bf16.msrb.mxu2 %v2023_v22  ;;  %v80_v22 = vld [vmem:[%s2796_s0 + $0x20] sm:$0xff]  ;;  %v2745_v31 = vpack.c.bf16 %v82_v19, %v82_v19  ;;  %v2749_v36 = vpack.c.bf16 %v83_v23, %v83_v23  ;;  %v2751_v40 = vpack.c.bf16 %v81_v29, %v81_v29  ;;  %v2382_v43 = vld [vmem:[#allocation2 + $0x54] sm:$0xf]  ;;  %v1712_v47 = vld [vmem:[#allocation2 + $0xd8] sm:$0xf0] }
  0x3f   :  { %960 = vmatpush.bf16.msrb.mxu3 %v2087_v26  ;;  %v1795_v26 = vor.u32 %v2418_v13, %v1792_v14  ;;  %v2747_v35 = vpack.c.bf16 %v80_v22, %v80_v22  ;;  %v2432_v37 = vld [vmem:[#allocation2 + $0x1e4] sm:$0xf]  ;;  %v2414_v48 = vld [vmem:[#allocation2 + $0x154] sm:$0xf]  ;;  %v1776_v49 = vld [vmem:[#allocation2 + $0x158] sm:$0xf0] }
  0x40   :  { %922 = vmatpush.bf16.msrb.mxu0 %v1887_v32  ;;  %v1720_v32 = vld [vmem:[#allocation2 + $0xe8] sm:$0xf0]  ;;  %v1840_v51 = vld [vmem:[#allocation2 + $0x1d8] sm:$0xf0]  ;;  %v1779_v54 = vor.u32 %v2414_v48, %v1776_v49  ;;  %v2380_v55 = vld [vmem:[#allocation2 + $0x44] sm:$0xf] }
  0x41   :  { %935 = vmatpush.bf16.msrb.mxu1 %v1951_v33  ;;  %v2416_v33 = vld [vmem:[#allocation2 + $0x164] sm:$0xf]  ;;  %v1723_v41 = vor.u32 %v2400_v28, %v1720_v32  ;;  %v1768_v62 = vld [vmem:[#allocation2 + $0x148] sm:$0xf0]  ;;  %v2378_v4 = vld [vmem:[#allocation2 + $0x34] sm:$0xf] }
  0x42   :  { %948 = vmatpush.bf16.msrb.mxu2 %v2015_v34  ;;  %v1784_v34 = vld [vmem:[#allocation2 + $0x168] sm:$0xf0]  ;;  %v2396_v58 = vld [vmem:[#allocation2 + $0xc4] sm:$0xf]  ;;  %v1632_v8 = vld [vmem:[#allocation2 + $0x38] sm:$0xf0] }
  0x43   :  { %961 = vmatpush.bf16.msrb.mxu3 %v2079_v38  ;;  %v1848_v38 = vld [vmem:[#allocation2 + $0x1e8] sm:$0xf0]  ;;  %v1787_v42 = vor.u32 %v2416_v33, %v1784_v34  ;;  %v2428_v63 = vld [vmem:[#allocation2 + $0x1c4] sm:$0xf]  ;;  %v2394_v9 = vld [vmem:[#allocation2 + $0xb4] sm:$0xf] }
  0x44   :  { %923 = vmatpush.bf16.msrb.mxu0 %v1879_v44  ;;  %v1648_v44 = vld [vmem:[#allocation2 + $0x58] sm:$0xf0]  ;;  %v1832_v0 = vld [vmem:[#allocation2 + $0x1c8] sm:$0xf0]  ;;  %v2410_v12 = vld [vmem:[#allocation2 + $0x134] sm:$0xf] }
  0x45   :  { %936 = vmatpush.bf16.msrb.mxu1 %v1943_v45  ;;  %v2398_v45 = vld [vmem:[#allocation2 + $0xd4] sm:$0xf]  ;;  %v1651_v52 = vor.u32 %v2382_v43, %v1648_v44  ;;  %v1835_v10 = vor.u32 %v2428_v63, %v1832_v0  ;;  %v1760_v13 = vld [vmem:[#allocation2 + $0x138] sm:$0xf0]  ;;  %v2376_v19 = vld [vmem:[#allocation2 + $0x24] sm:$0xf] }
  0x46   :  { %949 = vmatpush.bf16.msrb.mxu2 %v2007_v46  ;;  %v1851_v46 = vor.u32 %v2432_v37, %v1848_v38  ;;  %v1715_v53 = vor.u32 %v2398_v45, %v1712_v47  ;;  %v2426_v14 = vld [vmem:[#allocation2 + $0x1b4] sm:$0xf]  ;;  %v1763_v18 = vor.u32 %v2410_v12, %v1760_v13  ;;  %v1688_v23 = vld [vmem:[#allocation2 + $0xa8] sm:$0xf0]  ;;  %v2408_v24 = vld [vmem:[#allocation2 + $0x124] sm:$0xf] }
  0x47   :  { %962 = vmatpush.bf16.msrb.mxu3 %v2071_v50  ;;  %v2430_v50 = vld [vmem:[#allocation2 + $0x1d4] sm:$0xf]  ;;  %v1816_v27 = vld [vmem:[#allocation2 + $0x1a8] sm:$0xf0]  ;;  %v1616_v33 = vld [vmem:[#allocation2 + $0x18] sm:$0xf0] }
  0x48   :  { %924 = vmatpush.bf16.msrb.mxu0 %v1871_v56  ;;  %v1640_v56 = vld [vmem:[#allocation2 + $0x48] sm:$0xf0]  ;;  %v1843_v59 = vor.u32 %v2430_v50, %v1840_v51  ;;  %v2374_v32 = vld [vmem:[#allocation2 + $0x14] sm:$0xf]  ;;  %v1680_v38 = vld [vmem:[#allocation2 + $0x98] sm:$0xf0] }
  0x49   :  { %937 = vmatpush.bf16.msrb.mxu1 %v1935_v60  ;;  %v1704_v60 = vld [vmem:[#allocation2 + $0xc8] sm:$0xf0]  ;;  %v2390_v34 = vld [vmem:[#allocation2 + $0x94] sm:$0xf]  ;;  %v1808_v43 = vld [vmem:[#allocation2 + $0x198] sm:$0xf0]  ;;  %v1619_v44 = vor.u32 %v2374_v32, %v1616_v33 }
  0x4a   :  { %950 = vmatpush.bf16.msrb.mxu2 %v1999_v61  ;;  %v2412_v61 = vld [vmem:[#allocation2 + $0x144] sm:$0xf]  ;;  %v1707_v2 = vor.u32 %v2396_v58, %v1704_v60  ;;  %v1683_v47 = vor.u32 %v2390_v34, %v1680_v38  ;;  %v1672_v50 = vld [vmem:[#allocation2 + $0x88] sm:$0xf0]  ;;  %v1920_v58 = vld [vmem:[#allocation2 + $0x278] sm:$0xf0] }
  0x4b   :  { %963 = vmatpush.bf16.msrb.mxu3 %v2063_v1  ;;  %v1643_v1 = vor.u32 %v2380_v55, %v1640_v56  ;;  %v1771_v3 = vor.u32 %v2412_v61, %v1768_v62  ;;  %v2372_v45 = vld [vmem:[#allocation2 + $0x4] sm:$0xf]  ;;  %v1800_v55 = vld [vmem:[#allocation2 + $0x188] sm:$0xf0]  ;;  %v2450_v56 = vld [vmem:[#allocation2 + $0x274] sm:$0xf] }
  0x4c   :  { %925 = vmatpush.bf16.msrb.mxu0 %v1863_v11  ;;  %v1696_v11 = vld [vmem:[#allocation2 + $0xb8] sm:$0xf0]  ;;  %v2388_v49 = vld [vmem:[#allocation2 + $0x84] sm:$0xf]  ;;  %v2482_v62 = vld [vmem:[#allocation2 + $0x374] sm:$0xf] }
  0x4d   :  { %938 = vmatpush.bf16.msrb.mxu1 %v1927_v15  ;;  %v1824_v15 = vld [vmem:[#allocation2 + $0x1b8] sm:$0xf0]  ;;  %v1699_v17 = vor.u32 %v2394_v9, %v1696_v11  ;;  %v2404_v51 = vld [vmem:[#allocation2 + $0x104] sm:$0xf]  ;;  %v1675_v0 = vor.u32 %v2388_v49, %v1672_v50  ;;  %v1912_v12 = vld [vmem:[#allocation2 + $0x268] sm:$0xf0] }
  0x4e   :  { %951 = vmatpush.bf16.msrb.mxu2 %v1991_v16  ;;  %v1635_v16 = vor.u32 %v2378_v4, %v1632_v8  ;;  %v1827_v22 = vor.u32 %v2426_v14, %v1824_v15  ;;  %v1984_v61 = vld [vmem:[#allocation2 + $0x2f8] sm:$0xf0]  ;;  %v1923_v8 = vor.u32 %v2450_v56, %v1920_v58  ;;  %v2448_v11 = vld [vmem:[#allocation2 + $0x264] sm:$0xf]  ;;  %v1976_v15 = vld [vmem:[#allocation2 + $0x2e8] sm:$0xf0] }
  0x4f   :  { %964 = vmatpush.bf16.msrb.mxu3 %v2055_v20  ;;  %926 = vmatmul.bf16.vlgmr.msrb.gmra.mxu0 %v2747_v35  ;;  %v1624_v20 = vld [vmem:[#allocation2 + $0x28] sm:$0xf0]  ;;  %v2048_v63 = vld [vmem:[#allocation2 + $0x378] sm:$0xf0]  ;;  %v2464_v13 = vld [vmem:[#allocation2 + $0x2e4] sm:$0xf] }
  0x50   :  { %970 = vmatpush.bf16.msra.mxu0 %v1667_v21  ;;  %939 = vmatmul.bf16.vlgmr.msrb.gmra.mxu1 %v2751_v40  ;;  %v2392_v21 = vld [vmem:[#allocation2 + $0xa4] sm:$0xf]  ;;  %v1627_v28 = vor.u32 %v2376_v19, %v1624_v20  ;;  %v2104_v19 = vld [vmem:[#allocation2 + $0x3e8] sm:$0xf0]  ;;  %v1915_v20 = vor.u32 %v2448_v11, %v1912_v12  ;;  %v2096_v32 = vld [vmem:[#allocation2 + $0x3d8] sm:$0xf0] }
  0x51   :  { %983 = vmatpush.bf16.msra.mxu1 %v1731_v25  ;;  %952 = vmatmul.bf16.vlgmr.msrb.gmra.mxu2 %v2745_v31  ;;  %v1752_v25 = vld [vmem:[#allocation2 + $0x128] sm:$0xf0]  ;;  %v1691_v29 = vor.u32 %v2392_v21, %v1688_v23  ;;  %v1979_v21 = vor.u32 %v2464_v13, %v1976_v15  ;;  %v2446_v23 = vld [vmem:[#allocation2 + $0x254] sm:$0xf]  ;;  %v2444_v38 = vld [vmem:[#allocation2 + $0x244] sm:$0xf] }
  0x52   :  { %996 = vmatpush.bf16.msra.mxu2 %v1795_v26  ;;  %965 = vmatmul.bf16.vlgmr.msrb.gmra.mxu3 %v2749_v36  ;;  %v2424_v26 = vld [vmem:[#allocation2 + $0x1a4] sm:$0xf]  ;;  %v2458_v49 = vld [vmem:[#allocation2 + $0x2b4] sm:$0xf]  ;;  %v1872_v12 = vld [vmem:[#allocation2 + $0x218] sm:$0xf0] }
  0x53   :  { %1009 = vmatpush.bf16.msra.mxu3 %v1859_v30  ;;  %v1755_v30 = vor.u32 %v2408_v24, %v1752_v25  ;;  %v1819_v37 = vor.u32 %v2424_v26, %v1816_v27  ;;  %v1904_v24 = vld [vmem:[#allocation2 + $0x258] sm:$0xf0]  ;;  %v2462_v25 = vld [vmem:[#allocation2 + $0x2d4] sm:$0xf] }
  0x54   :  { %971 = vmatpush.bf16.msra.mxu0 %v1659_v39  ;;  %v2406_v39 = vld [vmem:[#allocation2 + $0x114] sm:$0xf]  ;;  %v1968_v27 = vld [vmem:[#allocation2 + $0x2d8] sm:$0xf0]  ;;  %v1907_v33 = vor.u32 %v2446_v23, %v1904_v24  ;;  %v1864_v24 = vld [vmem:[#allocation2 + $0x208] sm:$0xf0] }
  0x55   :  { %984 = vmatpush.bf16.msra.mxu1 %v1723_v41  ;;  %v1744_v41 = vld [vmem:[#allocation2 + $0x118] sm:$0xf0]  ;;  %v1971_v34 = vor.u32 %v2462_v25, %v1968_v27  ;;  %v2438_v11 = vld [vmem:[#allocation2 + $0x214] sm:$0xf]  ;;  %v2452_v25 = vld [vmem:[#allocation2 + $0x284] sm:$0xf] }
  0x56   :  { %997 = vmatpush.bf16.msra.mxu2 %v1787_v42  ;;  %v2422_v42 = vld [vmem:[#allocation2 + $0x194] sm:$0xf]  ;;  %v1747_v48 = vor.u32 %v2406_v39, %v1744_v41  ;;  %v1896_v39 = vld [vmem:[#allocation2 + $0x248] sm:$0xf0]  ;;  %v1936_v15 = vld [vmem:[#allocation2 + $0x298] sm:$0xf0] }
  0x57   :  { %1010 = vmatpush.bf16.msra.mxu3 %v1851_v46  ;;  %v1608_v46 = vld [vmem:[#allocation2 + $0x8] sm:$0xf0]  ;;  %v2454_v13 = vld [vmem:[#allocation2 + $0x294] sm:$0xf] }
  0x58   :  { %972 = vmatpush.bf16.msra.mxu0 %v1651_v52  ;;  %v1811_v52 = vor.u32 %v2422_v42, %v1808_v43  ;;  %v1611_v60 = vor.u32 %v2372_v45, %v1608_v46  ;;  %v1960_v42 = vld [vmem:[#allocation2 + $0x2c8] sm:$0xf0]  ;;  %v2476_v43 = vld [vmem:[#allocation2 + $0x344] sm:$0xf] }
  0x59   :  { %985 = vmatpush.bf16.msra.mxu1 %v1715_v53  ;;  %v1736_v53 = vld [vmem:[#allocation2 + $0x108] sm:$0xf0]  ;;  %v2492_v45 = vld [vmem:[#allocation2 + $0x3c4] sm:$0xf] }
  0x5a   :  { %998 = vmatpush.bf16.msra.mxu2 %v1779_v54  ;;  %v2420_v54 = vld [vmem:[#allocation2 + $0x184] sm:$0xf] }
  0x5b   :  { %1011 = vmatpush.bf16.msra.mxu3 %v1843_v59  ;;  %v2466_v59 = vld [vmem:[#allocation2 + $0x2f4] sm:$0xf]  ;;  %v1803_v4 = vor.u32 %v2420_v54, %v1800_v55  ;;  %v2080_v55 = vld [vmem:[#allocation2 + $0x3b8] sm:$0xf0] }
  0x5c   :  { %973 = vmatpush.bf16.msra.mxu0 %v1643_v1  ;;  %v1739_v1 = vor.u32 %v2404_v51, %v1736_v53  ;;  %v1987_v9 = vor.u32 %v2466_v59, %v1984_v61  ;;  %v1952_v51 = vld [vmem:[#allocation2 + $0x2b8] sm:$0xf0]  ;;  %v2490_v54 = vld [vmem:[#allocation2 + $0x3b4] sm:$0xf]  ;;  %v1880_v61 = vld [vmem:[#allocation2 + $0x228] sm:$0xf0] }
  0x5d   :  { %986 = vmatpush.bf16.msra.mxu1 %v1707_v2  ;;  %v2498_v2 = vld [vmem:[#allocation2 + $0x3f4] sm:$0xf]  ;;  %v2016_v53 = vld [vmem:[#allocation2 + $0x338] sm:$0xf0]  ;;  %v1955_v58 = vor.u32 %v2458_v49, %v1952_v51  ;;  %v2511_v49 = vld [vmem:[#allocation4 + $0x54] sm:$0xf0] }
  0x5e   :  { %999 = vmatpush.bf16.msra.mxu2 %v1771_v3  ;;  %v2112_v3 = vld [vmem:[#allocation2 + $0x3f8] sm:$0xf0] }
  0x5f   :  { %1012 = vmatpush.bf16.msra.mxu3 %v1835_v10  ;;  %v2051_v10 = vor.u32 %v2482_v62, %v2048_v63  ;;  %v2115_v14 = vor.u32 %v2498_v2, %v2112_v3  ;;  %v2456_v62 = vld [vmem:[#allocation2 + $0x2a4] sm:$0xf]  ;;  %v2083_v63 = vor.u32 %v2490_v54, %v2080_v55  ;;  %v2008_v2 = vld [vmem:[#allocation2 + $0x328] sm:$0xf0] }
  0x60   :  { %974 = vmatpush.bf16.msra.mxu0 %v1635_v16  ;;  %v2480_v16 = vld [vmem:[#allocation2 + $0x364] sm:$0xf] }
  0x61   :  { %987 = vmatpush.bf16.msra.mxu1 %v1699_v17  ;;  %v2040_v17 = vld [vmem:[#allocation2 + $0x368] sm:$0xf0]  ;;  %v2488_v3 = vld [vmem:[#allocation2 + $0x3a4] sm:$0xf] }
  0x62   :  { %1000 = vmatpush.bf16.msra.mxu2 %v1763_v18  ;;  %v2496_v18 = vld [vmem:[#allocation2 + $0x3e4] sm:$0xf] }
  0x63   :  { %1013 = vmatpush.bf16.msra.mxu3 %v1827_v22  ;;  %v2043_v22 = vor.u32 %v2480_v16, %v2040_v17  ;;  %v2107_v26 = vor.u32 %v2496_v18, %v2104_v19  ;;  %v2470_v16 = vld [vmem:[#allocation2 + $0x314] sm:$0xf]  ;;  %v2000_v17 = vld [vmem:[#allocation2 + $0x318] sm:$0xf0]  ;;  %v2508_v54 = vld [vmem:[#allocation4 + $0x44] sm:$0xf] }
  0x64   :  { %975 = vmatpush.bf16.msra.mxu0 %v1627_v28  ;;  %v2478_v28 = vld [vmem:[#allocation2 + $0x354] sm:$0xf]  ;;  %v2064_v19 = vld [vmem:[#allocation2 + $0x398] sm:$0xf0]  ;;  %v2003_v23 = vor.u32 %v2470_v16, %v2000_v17  ;;  %v2768_v17 = vld [vmem:[%s2798_s2] sm:$0x3] }
  0x65   :  { %988 = vmatpush.bf16.msra.mxu1 %v1691_v29  ;;  %v2032_v29 = vld [vmem:[#allocation2 + $0x358] sm:$0xf0]  ;;  %v2486_v18 = vld [vmem:[#allocation2 + $0x394] sm:$0xf] }
  0x66   :  { %1001 = vmatpush.bf16.msra.mxu2 %v1755_v30  ;;  %v2494_v30 = vld [vmem:[#allocation2 + $0x3d4] sm:$0xf]  ;;  %v2067_v27 = vor.u32 %v2486_v18, %v2064_v19  ;;  %v2118_v18 = vld [vmem:[#allocation4] sm:$0xf]  ;;  %v2501_v19 = vld [vmem:[#allocation4 + $0x4] sm:$0xf0] }
  0x67   :  { %1014 = vmatpush.bf16.msra.mxu3 %v1819_v37  ;;  %v2035_v37 = vor.u32 %v2478_v28, %v2032_v29  ;;  %v2099_v41 = vor.u32 %v2494_v30, %v2096_v32  ;;  %v2468_v28 = vld [vmem:[#allocation2 + $0x304] sm:$0xf]  ;;  %v1992_v29 = vld [vmem:[#allocation2 + $0x308] sm:$0xf0] }
  0x68   :  { %976 = vmatpush.bf16.msra.mxu0 %v1619_v44  ;;  %v2024_v44 = vld [vmem:[#allocation2 + $0x348] sm:$0xf0]  ;;  %v2484_v30 = vld [vmem:[#allocation2 + $0x384] sm:$0xf] }
  0x69   :  { %989 = vmatpush.bf16.msra.mxu1 %v1683_v47  ;;  %v2442_v47 = vld [vmem:[#allocation2 + $0x234] sm:$0xf]  ;;  %v2056_v32 = vld [vmem:[#allocation2 + $0x388] sm:$0xf0] }
  0x6a   :  { %1002 = vmatpush.bf16.msra.mxu2 %v1747_v48  ;;  %v1888_v48 = vld [vmem:[#allocation2 + $0x238] sm:$0xf0] }
  0x6b   :  { %1015 = vmatpush.bf16.msra.mxu3 %v1811_v52  ;;  %v2474_v52 = vld [vmem:[#allocation2 + $0x334] sm:$0xf]  ;;  %v1891_v56 = vor.u32 %v2442_v47, %v1888_v48  ;;  %v2158_v48 = vld [vmem:[#allocation4 + $0x50] sm:$0xf] }
  0x6c   :  { %977 = vmatpush.bf16.msra.mxu0 %v1611_v60  ;;  %v2019_v59 = vor.u32 %v2474_v52, %v2016_v53  ;;  %v2440_v60 = vld [vmem:[#allocation2 + $0x224] sm:$0xf]  ;;  %v2159_v51 = vor.u32 %v2511_v49, %v2158_v48  ;;  %v2150_v52 = vld [vmem:[#allocation4 + $0x40] sm:$0xf]  ;;  %v2509_v53 = vld [vmem:[#allocation4 + $0x44] sm:$0xf0] }
  0x6d   :  { %990 = vmatpush.bf16.msra.mxu1 %v1675_v0  ;;  %v1944_v0 = vld [vmem:[#allocation2 + $0x2a8] sm:$0xf0] }
  0x6e   :  { %1003 = vmatpush.bf16.msra.mxu2 %v1739_v1  ;;  %v2472_v1 = vld [vmem:[#allocation2 + $0x324] sm:$0xf] }
  0x6f   :  { %1016 = vmatpush.bf16.msra.mxu3 %v1803_v4  ;;  %978 = vmatmul.bf16.vlgmr.msra.gmra.mxu0 %v2724_v5  ;;  %v2088_v5 = vld [vmem:[#allocation2 + $0x3c8] sm:$0xf0] }
  0x70   :  { %1022 = vmatpush.bf16.msrb.mxu0 %v1923_v8  ;;  %991 = vmatmul.bf16.vlgmr.msra.gmra.mxu1 %v2728_v7  ;;  %v2027_v7 = vor.u32 %v2476_v43, %v2024_v44  ;;  %v2091_v50 = vor.u32 %v2492_v45, %v2088_v5  ;;  %v2072_v4 = vld [vmem:[#allocation2 + $0x3a8] sm:$0xf0]  ;;  %v1883_v8 = vor.u32 %v2440_v60, %v1880_v61  ;;  %v2166_v45 = vld [vmem:[#allocation4 + $0x60] sm:$0xf]  ;;  %v2513_v5 = vld [vmem:[#allocation4 + $0x64] sm:$0xf0] }
  0x71   :  { %1035 = vmatpush.bf16.msrb.mxu1 %v1987_v9  ;;  %1004 = vmatmul.bf16.vlgmr.msra.gmra.mxu2 %v2712_v57  ;;  %v2460_v57 = vld [vmem:[#allocation2 + $0x2c4] sm:$0xf]  ;;  %v1947_v9 = vor.u32 %v2456_v62, %v1944_v0  ;;  %v2144_v61 = vld [vmem:[#allocation4 + $0x38] sm:$0xf0]  ;;  %v2505_v0 = vld [vmem:[#allocation4 + $0x24] sm:$0xf0] }
  0x72   :  { %1048 = vmatpush.bf16.msrb.mxu2 %v2051_v10  ;;  %1017 = vmatmul.bf16.vlgmr.msra.gmra.mxu3 %v2726_v6  ;;  %v1899_v6 = vor.u32 %v2444_v38, %v1896_v39  ;;  %v1963_v46 = vor.u32 %v2460_v57, %v1960_v42  ;;  %v2011_v10 = vor.u32 %v2472_v1, %v2008_v2  ;;  %v2514_v38 = vld [vmem:[#allocation4 + $0x74] sm:$0xf]  ;;  %v2176_v39 = vld [vmem:[#allocation4 + $0x78] sm:$0xf0]  ;;  %v2504_v1 = vld [vmem:[#allocation4 + $0x24] sm:$0xf] }
  0x73   :  { %1061 = vmatpush.bf16.msrb.mxu3 %v2115_v14  ;;  %v2075_v14 = vor.u32 %v2488_v3, %v2072_v4  ;;  %v2059_v42 = vor.u32 %v2484_v30, %v2056_v32  ;;  %v2179_v44 = vor.u32 %v2514_v38, %v2176_v39  ;;  %v2136_v3 = vld [vmem:[#allocation4 + $0x28] sm:$0xf0] }
  0x74   :  { %1023 = vmatpush.bf16.msrb.mxu0 %v1915_v20  ;;  %v1875_v20 = vor.u32 %v2438_v11, %v1872_v12  ;;  %v2126_v11 = vld [vmem:[#allocation4 + $0x10] sm:$0xf]  ;;  %v2503_v12 = vld [vmem:[#allocation4 + $0x14] sm:$0xf0] }
  0x75   :  { %1036 = vmatpush.bf16.msrb.mxu1 %v1979_v21  ;;  %v2436_v21 = vld [vmem:[#allocation2 + $0x204] sm:$0xf] }
  0x76   :  { %1049 = vmatpush.bf16.msrb.mxu2 %v2043_v22  ;;  %v1939_v22 = vor.u32 %v2454_v13, %v1936_v15  ;;  %v2502_v13 = vld [vmem:[#allocation4 + $0x14] sm:$0xf]  ;;  %v2128_v15 = vld [vmem:[#allocation4 + $0x18] sm:$0xf0] }
  0x77   :  { %1062 = vmatpush.bf16.msrb.mxu3 %v2107_v26  ;;  %v1928_v26 = vld [vmem:[#allocation2 + $0x288] sm:$0xf0]  ;;  %v2131_v16 = vor.u32 %v2502_v13, %v2128_v15  ;;  %v2521_v15 = vld [vmem:[#allocation4 + $0xa4] sm:$0xf0] }
  0x78   :  { %1024 = vmatpush.bf16.msrb.mxu0 %v1907_v33  ;;  %v2174_v33 = vld [vmem:[#allocation4 + $0x70] sm:$0xf]  ;;  %v1931_v57 = vor.u32 %v2452_v25, %v1928_v26 }
  0x79   :  { %1037 = vmatpush.bf16.msrb.mxu1 %v1971_v34  ;;  %v2515_v34 = vld [vmem:[#allocation4 + $0x74] sm:$0xf0] }
  0x7a   :  { %1050 = vmatpush.bf16.msrb.mxu2 %v2035_v37  ;;  %v1867_v37 = vor.u32 %v2436_v21, %v1864_v24  ;;  %v2175_v43 = vor.u32 %v2515_v34, %v2174_v33  ;;  %v222_v24 = vperm.slane %v2768_v17, 0 }
  0x7b   :  { %1063 = vmatpush.bf16.msrb.mxu3 %v2099_v41  ;;  %v1995_v41 = vor.u32 %v2468_v28, %v1992_v29 }
  0x7c   :  { %1025 = vmatpush.bf16.msrb.mxu0 %v1899_v6  ;;  %v2512_v6 = vld [vmem:[#allocation4 + $0x64] sm:$0xf] }
  0x7d   :  { %1038 = vmatpush.bf16.msrb.mxu1 %v1963_v46  ;;  %v2167_v46 = vor.u32 %v2513_v5, %v2166_v45  ;;  %v2531_v45 = vld [vmem:[#allocation4 + $0xf4] sm:$0xf0]  ;;  %v2530_v5 = vld [vmem:[#allocation4 + $0xf4] sm:$0xf] }
  0x7e   :  { %1051 = vmatpush.bf16.msrb.mxu2 %v2027_v7  ;;  %v2168_v7 = vld [vmem:[#allocation4 + $0x68] sm:$0xf0] }
  0x7f   :  { %1064 = vmatpush.bf16.msrb.mxu3 %v2091_v50  ;;  %v2171_v47 = vor.u32 %v2512_v6, %v2168_v7  ;;  %v2510_v50 = vld [vmem:[#allocation4 + $0x54] sm:$0xf]  ;;  %v2230_v7 = vld [vmem:[#allocation4 + $0xe0] sm:$0xf] }
  0x80   :  { %1026 = vmatpush.bf16.msrb.mxu0 %v1891_v56  ;;  %v2142_v56 = vld [vmem:[#allocation4 + $0x30] sm:$0xf] }
  0x81   :  { %1039 = vmatpush.bf16.msrb.mxu1 %v1955_v58  ;;  %v2507_v58 = vld [vmem:[#allocation4 + $0x34] sm:$0xf0] }
  0x82   :  { %1052 = vmatpush.bf16.msrb.mxu2 %v2019_v59  ;;  %v2506_v59 = vld [vmem:[#allocation4 + $0x34] sm:$0xf]  ;;  %v2143_v60 = vor.u32 %v2507_v58, %v2142_v56 }
  0x83   :  { %1065 = vmatpush.bf16.msrb.mxu3 %v2083_v63  ;;  %v2147_v62 = vor.u32 %v2506_v59, %v2144_v61  ;;  %v2134_v63 = vld [vmem:[#allocation4 + $0x20] sm:$0xf]  ;;  %v2526_v56 = vld [vmem:[#allocation4 + $0xd4] sm:$0xf] }
  0x84   :  { %1027 = vmatpush.bf16.msrb.mxu0 %v1883_v8  ;;  %v2135_v2 = vor.u32 %v2505_v0, %v2134_v63  ;;  %v2139_v8 = vor.u32 %v2504_v1, %v2136_v3  ;;  %v2525_v63 = vld [vmem:[#allocation4 + $0xc4] sm:$0xf0]  ;;  %v2524_v1 = vld [vmem:[#allocation4 + $0xc4] sm:$0xf] }
  0x85   :  { %1040 = vmatpush.bf16.msrb.mxu1 %v1947_v9 }
  0x86   :  { %1053 = vmatpush.bf16.msrb.mxu2 %v2011_v10 }
  0x87   :  { %1066 = vmatpush.bf16.msrb.mxu3 %v2075_v14  ;;  %v2127_v14 = vor.u32 %v2503_v12, %v2126_v11  ;;  %v2208_v12 = vld [vmem:[#allocation4 + $0xb8] sm:$0xf0] }
  0x88   :  { %1028 = vmatpush.bf16.msrb.mxu0 %v1875_v20  ;;  %v2500_v20 = vld [vmem:[#allocation4 + $0x4] sm:$0xf] }
  0x89   :  { %1041 = vmatpush.bf16.msrb.mxu1 %v1939_v22  ;;  %v2119_v22 = vor.u32 %v2501_v19, %v2118_v18 }
  0x8a   :  { %1054 = vmatpush.bf16.msrb.mxu2 %v2003_v23  ;;  %v2120_v23 = vld [vmem:[#allocation4 + $0x8] sm:$0xf0] }
  0x8b   :  { %1067 = vmatpush.bf16.msrb.mxu3 %v2067_v27  ;;  %v2123_v26 = vor.u32 %v2500_v20, %v2120_v23  ;;  %v2200_v20 = vld [vmem:[#allocation4 + $0xa8] sm:$0xf0]  ;;  %v2190_v23 = vld [vmem:[#allocation4 + $0x90] sm:$0xf] }
  0x8c   :  { %1029 = vmatpush.bf16.msrb.mxu0 %v1867_v37 }
  0x8d   :  { %1042 = vmatpush.bf16.msrb.mxu1 %v1931_v57 }
  0x8e   :  { %1055 = vmatpush.bf16.msrb.mxu2 %v1995_v41 }
  0x8f   :  { %1068 = vmatpush.bf16.msrb.mxu3 %v2059_v42  ;;  %1030 = vmatmul.bf16.vlgmr.msrb.gmra.mxu0 %v2747_v35  ;;  %v2160_v35 = vld [vmem:[#allocation4 + $0x58] sm:$0xf0] }
  0x90   :  { %1278 = vmatpush.bf16.msra.mxu0 %v2175_v43  ;;  %1043 = vmatmul.bf16.vlgmr.msrb.gmra.mxu1 %v2751_v40  ;;  %v2163_v40 = vor.u32 %v2510_v50, %v2160_v35  ;;  %v2232_v35 = vld [vmem:[#allocation4 + $0xe8] sm:$0xf0] }
  0x91   :  { %1056 = vmatmul.bf16.vlgmr.msrb.gmra.mxu2 %v2745_v31  ;;  %v2152_v31 = vld [vmem:[#allocation4 + $0x48] sm:$0xf0] }
  0x92   :  { %1304 = vmatpush.bf16.msra.mxu2 %v2179_v44  ;;  %1069 = vmatmul.bf16.vlgmr.msrb.gmra.mxu3 %v2749_v36  ;;  %v2151_v36 = vor.u32 %v2509_v53, %v2150_v52  ;;  %v2155_v55 = vor.u32 %v2508_v54, %v2152_v31  ;;  %v2238_v44 = vld [vmem:[#allocation4 + $0xf0] sm:$0xf] }
  0x93   :  { %v2239_v6 = vor.u32 %v2531_v45, %v2238_v44 }
  0x94   :  { %1279 = vmatpush.bf16.msra.mxu0 %v2167_v46  ;;  %v2240_v46 = vld [vmem:[#allocation4 + $0xf8] sm:$0xf0] }
  0x95   :  { %v2243_v50 = vor.u32 %v2530_v5, %v2240_v46  ;;  %1291 = vmatpush.bf16.msra.mxu1 %v2239_v6 }
  0x96   :  { %1305 = vmatpush.bf16.msra.mxu2 %v2171_v47  ;;  %v2529_v47 = vld [vmem:[#allocation4 + $0xe4] sm:$0xf0] }
  0x97   :  { %v2231_v53 = vor.u32 %v2529_v47, %v2230_v7  ;;  %1317 = vmatpush.bf16.msra.mxu3 %v2243_v50 }
  0x98   :  { %1280 = vmatpush.bf16.msra.mxu0 %v2159_v51  ;;  %v2528_v51 = vld [vmem:[#allocation4 + $0xe4] sm:$0xf] }
  0x99   :  { %v2235_v54 = vor.u32 %v2528_v51, %v2232_v35  ;;  %1292 = vmatpush.bf16.msra.mxu1 %v2231_v53 }
  0x9a   :  { %1306 = vmatpush.bf16.msra.mxu2 %v2163_v40 }
  0x9b   :  { %1318 = vmatpush.bf16.msra.mxu3 %v2235_v54 }
  0x9c   :  { %1281 = vmatpush.bf16.msra.mxu0 %v2151_v36  ;;  %v2222_v36 = vld [vmem:[#allocation4 + $0xd0] sm:$0xf] }
  0x9e   :  { %1307 = vmatpush.bf16.msra.mxu2 %v2155_v55  ;;  %v2527_v55 = vld [vmem:[#allocation4 + $0xd4] sm:$0xf0] }
  0x9f   :  { %v2223_v59 = vor.u32 %v2527_v55, %v2222_v36  ;;  %v2302_v55 = vld [vmem:[#allocation6 + $0x70] sm:$0xf] }
  0xa0   :  { %1282 = vmatpush.bf16.msra.mxu0 %v2143_v60  ;;  %v2224_v60 = vld [vmem:[#allocation4 + $0xd8] sm:$0xf0] }
  0xa1   :  { %v2227_v0 = vor.u32 %v2526_v56, %v2224_v60  ;;  %1293 = vmatpush.bf16.msra.mxu1 %v2223_v59  ;;  %v2547_v56 = vld [vmem:[#allocation6 + $0x74] sm:$0xf0]  ;;  %v2304_v60 = vld [vmem:[#allocation6 + $0x78] sm:$0xf0] }
  0xa2   :  { %1308 = vmatpush.bf16.msra.mxu2 %v2147_v62  ;;  %v2214_v62 = vld [vmem:[#allocation4 + $0xc0] sm:$0xf]  ;;  %v2303_v59 = vor.u32 %v2547_v56, %v2302_v55 }
  0xa3   :  { %v2215_v3 = vor.u32 %v2525_v63, %v2214_v62  ;;  %1319 = vmatpush.bf16.msra.mxu3 %v2227_v0  ;;  %v2545_v62 = vld [vmem:[#allocation6 + $0x64] sm:$0xf0]  ;;  %v2544_v0 = vld [vmem:[#allocation6 + $0x64] sm:$0xf] }
  0xa4   :  { %1283 = vmatpush.bf16.msra.mxu0 %v2135_v2  ;;  %v2216_v2 = vld [vmem:[#allocation4 + $0xc8] sm:$0xf0] }
  0xa5   :  { %1294 = vmatpush.bf16.msra.mxu1 %v2215_v3 }
  0xa6   :  { %1309 = vmatpush.bf16.msra.mxu2 %v2139_v8  ;;  %v2206_v8 = vld [vmem:[#allocation4 + $0xb0] sm:$0xf] }
  0xa8   :  { %1284 = vmatpush.bf16.msra.mxu0 %v2127_v14  ;;  %v2198_v14 = vld [vmem:[#allocation4 + $0xa0] sm:$0xf] }
  0xa9   :  { %v2199_v19 = vor.u32 %v2521_v15, %v2198_v14  ;;  %v2543_v14 = vld [vmem:[#allocation6 + $0x54] sm:$0xf0]  ;;  %v2542_v15 = vld [vmem:[#allocation6 + $0x54] sm:$0xf] }
  0xaa   :  { %1310 = vmatpush.bf16.msra.mxu2 %v2131_v16  ;;  %v2520_v16 = vld [vmem:[#allocation4 + $0xa4] sm:$0xf] }
  0xac   :  { %v875_v4 = vpop.f32.mrf.mxu0  ;;  %1285 = vmatpush.bf16.msra.mxu0 %v2119_v22  ;;  %v2203_v22 = vor.u32 %v2520_v16, %v2200_v20  ;;  %v2288_v16 = vld [vmem:[#allocation6 + $0x58] sm:$0xf0] }
  0xad   :  { %v888_v9 = vpop.f32.mrf.mxu1  ;;  %v876_v29 = vadd.f32 %v875_v4, %v222_v24  ;;  %v2219_v4 = vor.u32 %v2524_v1, %v2216_v2  ;;  %v2519_v24 = vld [vmem:[#allocation4 + $0x94] sm:$0xf0]  ;;  %v2296_v1 = vld [vmem:[#allocation6 + $0x68] sm:$0xf0]  ;;  %v2366_v2 = vld [vmem:[#allocation6 + $0xf0] sm:$0xf] }
  0xae   :  { %1311 = vmatpush.bf16.msra.mxu2 %v2123_v26  ;;  %v2191_v26 = vor.u32 %v2519_v24, %v2190_v23 }
  0xaf   :  { %v889_v32 = vadd.f32 %v888_v9, %v876_v29  ;;  %1320 = vmatpush.bf16.msra.mxu3 %v2219_v4  ;;  %v2523_v9 = vld [vmem:[#allocation4 + $0xb4] sm:$0xf0] }
  0xb0   :  { %v2207_v11 = vor.u32 %v2523_v9, %v2206_v8  ;;  %1534 = vmatpush.bf16.msrb.mxu0 %v2303_v59  ;;  %v2563_v4 = vld [vmem:[#allocation6 + $0xf4] sm:$0xf0]  ;;  %v2562_v8 = vld [vmem:[#allocation6 + $0xf4] sm:$0xf]  ;;  %v2368_v9 = vld [vmem:[#allocation6 + $0xf8] sm:$0xf0] }
  0xb2   :  { %1295 = vmatpush.bf16.msra.mxu1 %v2207_v11  ;;  %v2367_v11 = vor.u32 %v2563_v4, %v2366_v2  ;;  %v2256_v2 = vld [vmem:[#allocation6 + $0x18] sm:$0xf0]  ;;  %v2326_v4 = vld [vmem:[#allocation6 + $0xa0] sm:$0xf] }
  0xb4   :  { %v901_v10 = vpop.f32.mrf.mxu2  ;;  %v877_v25 = vpop.f32.mrf.mxu0 }
  0xb5   :  { %v914_v21 = vpop.f32.mrf.mxu3  ;;  %v890_v27 = vpop.f32.mrf.mxu1  ;;  %v902_v33 = vadd.f32 %v901_v10, %v889_v32  ;;  %v2522_v10 = vld [vmem:[#allocation4 + $0xb4] sm:$0xf]  ;;  %v2182_v32 = vld [vmem:[#allocation4 + $0x80] sm:$0xf] }
  0xb6   :  { %v2211_v13 = vor.u32 %v2522_v10, %v2208_v12  ;;  %1296 = vmatpush.bf16.msra.mxu1 %v2199_v19  ;;  %v2518_v25 = vld [vmem:[#allocation4 + $0x94] sm:$0xf]  ;;  %v2192_v27 = vld [vmem:[#allocation4 + $0x98] sm:$0xf0]  ;;  %v2299_v10 = vor.u32 %v2544_v0, %v2296_v1  ;;  %v2371_v12 = vor.u32 %v2562_v8, %v2368_v9  ;;  %v2561_v19 = vld [vmem:[#allocation6 + $0xe4] sm:$0xf0] }
  0xb7   :  { %v915_v34 = vadd.f32 %v914_v21, %v902_v33  ;;  %v2195_v29 = vor.u32 %v2518_v25, %v2192_v27  ;;  %v2517_v33 = vld [vmem:[#allocation4 + $0x84] sm:$0xf0]  ;;  %v2278_v25 = vld [vmem:[#allocation6 + $0x40] sm:$0xf]  ;;  %v2291_v27 = vor.u32 %v2542_v15, %v2288_v16  ;;  %v2534_v0 = vld [vmem:[#allocation6 + $0x14] sm:$0xf] }
  0xb8   :  { %1321 = vmatpush.bf16.msra.mxu3 %v2211_v13  ;;  %v2286_v13 = vld [vmem:[#allocation6 + $0x50] sm:$0xf]  ;;  %v2553_v8 = vld [vmem:[#allocation6 + $0xa4] sm:$0xf0]  ;;  %v2552_v9 = vld [vmem:[#allocation6 + $0xa4] sm:$0xf] }
  0xb9   :  { %v2287_v23 = vor.u32 %v2543_v14, %v2286_v13  ;;  %v2246_v13 = vld [vmem:[#allocation6] sm:$0xf]  ;;  %v2533_v14 = vld [vmem:[#allocation6 + $0x4] sm:$0xf0]  ;;  %v2532_v15 = vld [vmem:[#allocation6 + $0x4] sm:$0xf] }
  0xba   :  { %1297 = vmatpush.bf16.msra.mxu1 %v2191_v26  ;;  %v2541_v26 = vld [vmem:[#allocation6 + $0x44] sm:$0xf0]  ;;  %v2247_v16 = vor.u32 %v2533_v14, %v2246_v13 }
  0xbc   :  { %v903_v28 = vpop.f32.mrf.mxu2  ;;  %1322 = vmatpush.bf16.msra.mxu3 %v2203_v22  ;;  %v2360_v22 = vld [vmem:[#allocation6 + $0xe8] sm:$0xf0] }
  0xbd   :  { %v916_v30 = vpop.f32.mrf.mxu3 }
  0xc0   :  { %1323 = vmatpush.bf16.msra.mxu3 %v2195_v29  ;;  %v2559_v29 = vld [vmem:[#allocation6 + $0xd4] sm:$0xf0] }
  0xcc   :  { %v927_v37 = vpop.f32.mrf.mxu0 }
  0xcd   :  { %v928_v38 = vadd.f32 %v927_v37, %v915_v34  ;;  %v940_v39 = vpop.f32.mrf.mxu1  ;;  %v2516_v34 = vld [vmem:[#allocation4 + $0x84] sm:$0xf] }
  0xcf   :  { %v941_v57 = vadd.f32 %v940_v39, %v928_v38  ;;  %v2183_v38 = vor.u32 %v2517_v33, %v2182_v32  ;;  %v2184_v39 = vld [vmem:[#allocation4 + $0x88] sm:$0xf0]  ;;  %v2540_v32 = vld [vmem:[#allocation6 + $0x44] sm:$0xf] }
  0xd0   :  { %v2280_v33 = vld [vmem:[#allocation6 + $0x48] sm:$0xf0] }
  0xd1   :  { %1298 = vmatpush.bf16.msra.mxu1 %v2183_v38 }
  0xd4   :  { %v953_v41 = vpop.f32.mrf.mxu2  ;;  %v929_v49 = vpop.f32.mrf.mxu0 }
  0xd5   :  { %v954_v42 = vadd.f32 %v953_v41, %v941_v57  ;;  %v966_v43 = vpop.f32.mrf.mxu3  ;;  %v942_v52 = vpop.f32.mrf.mxu1  ;;  %v2187_v41 = vor.u32 %v2516_v34, %v2184_v39  ;;  %1547 = vmatpush.bf16.msrb.mxu1 %v2367_v11  ;;  %v2352_v34 = vld [vmem:[#allocation6 + $0xd8] sm:$0xf0]  ;;  %v2342_v39 = vld [vmem:[#allocation6 + $0xc0] sm:$0xf]  ;;  %v2328_v11 = vld [vmem:[#allocation6 + $0xa8] sm:$0xf0] }
  0xd7   :  { %v967_v48 = vadd.f32 %v966_v43, %v954_v42  ;;  %1324 = vmatpush.bf16.msra.mxu3 %v2187_v41  ;;  %v223_v42 = vperm.slane %v2768_v17, 1  ;;  %v2557_v41 = vld [vmem:[#allocation6 + $0xc4] sm:$0xf0] }
  0xd9   :  { %v1074_v40 = vmax.f32 %v967_v48, 0.0 }
  0xdb   :  { %1076 = vst [vmem:[%s2803_s7] sm:$0xff] %v1074_v40  ;;  %v1078_v31 = vpack.c.bf16 %v1074_v40, %v1074_v40  ;;  %1573 = vmatpush.bf16.msrb.mxu3 %v2371_v12  ;;  %v2331_v12 = vor.u32 %v2552_v9, %v2328_v11 }
  0xdc   :  { %v955_v58 = vpop.f32.mrf.mxu2 }
  0xdd   :  { %1286 = vmatmul.bf16.vlgmr.msra.gmra.mxu0 %v1078_v31  ;;  %1312 = vmatmul.bf16.vlgmr.msra.gmra.mxu2 %v1078_v31  ;;  %v968_v61 = vpop.f32.mrf.mxu3  ;;  %v2546_v58 = vld [vmem:[#allocation6 + $0x74] sm:$0xf] }
  0xde   :  { %v2294_v61 = vld [vmem:[#allocation6 + $0x60] sm:$0xf]  ;;  %v2307_v63 = vor.u32 %v2546_v58, %v2304_v60 }
  0xdf   :  { %v2295_v3 = vor.u32 %v2545_v62, %v2294_v61  ;;  %v2254_v62 = vld [vmem:[#allocation6 + $0x10] sm:$0xf] }
  0xe0   :  { %1560 = vmatpush.bf16.msrb.mxu2 %v2307_v63  ;;  %v2535_v63 = vld [vmem:[#allocation6 + $0x14] sm:$0xf0] }
  0xe1   :  { %1535 = vmatpush.bf16.msrb.mxu0 %v2295_v3  ;;  %v2255_v1 = vor.u32 %v2535_v63, %v2254_v62  ;;  %v2259_v3 = vor.u32 %v2534_v0, %v2256_v2 }
  0xe4   :  { %1561 = vmatpush.bf16.msrb.mxu2 %v2299_v10  ;;  %v2327_v10 = vor.u32 %v2553_v8, %v2326_v4 }
  0xe5   :  { %1536 = vmatpush.bf16.msrb.mxu0 %v2287_v23 }
  0xe8   :  { %1562 = vmatpush.bf16.msrb.mxu2 %v2291_v27  ;;  %v2549_v27 = vld [vmem:[#allocation6 + $0x84] sm:$0xf0] }
  0xec   :  { %v979_v18 = vpop.f32.mrf.mxu0 }
  0xed   :  { %v992_v21 = vpop.f32.mrf.mxu1  ;;  %v980_v45 = vadd.f32 %v979_v18, %v223_v42  ;;  %v2358_v18 = vld [vmem:[#allocation6 + $0xe0] sm:$0xf]  ;;  %v2556_v42 = vld [vmem:[#allocation6 + $0xc4] sm:$0xf] }
  0xee   :  { %v2359_v20 = vor.u32 %v2561_v19, %v2358_v18  ;;  %v2248_v18 = vld [vmem:[#allocation6 + $0x8] sm:$0xf0] }
  0xef   :  { %v993_v5 = vadd.f32 %v992_v21, %v980_v45  ;;  %v2560_v21 = vld [vmem:[#allocation6 + $0xe4] sm:$0xf]  ;;  %v2270_v45 = vld [vmem:[#allocation6 + $0x30] sm:$0xf]  ;;  %v2251_v19 = vor.u32 %v2532_v15, %v2248_v18 }
  0xf0   :  { %v2363_v24 = vor.u32 %v2560_v21, %v2360_v22  ;;  %1548 = vmatpush.bf16.msrb.mxu1 %v2359_v20  ;;  %v2318_v20 = vld [vmem:[#allocation6 + $0x90] sm:$0xf]  ;;  %v2551_v21 = vld [vmem:[#allocation6 + $0x94] sm:$0xf0]  ;;  %v2550_v22 = vld [vmem:[#allocation6 + $0x94] sm:$0xf] }
  0xf1   :  { %v2319_v23 = vor.u32 %v2551_v21, %v2318_v20 }
  0xf2   :  { %1574 = vmatpush.bf16.msrb.mxu3 %v2363_v24  ;;  %v2320_v24 = vld [vmem:[#allocation6 + $0x98] sm:$0xf0] }
  0xf4   :  { %v1005_v28 = vpop.f32.mrf.mxu2  ;;  %v981_v37 = vpop.f32.mrf.mxu0 }
  0xf5   :  { %v1018_v30 = vpop.f32.mrf.mxu3  ;;  %v994_v57 = vpop.f32.mrf.mxu1  ;;  %v1006_v6 = vadd.f32 %v1005_v28, %v993_v5  ;;  %v2350_v28 = vld [vmem:[#allocation6 + $0xd0] sm:$0xf]  ;;  %v2539_v5 = vld [vmem:[#allocation6 + $0x34] sm:$0xf0] }
  0xf6   :  { %v2351_v37 = vor.u32 %v2559_v29, %v2350_v28  ;;  %v2279_v57 = vor.u32 %v2541_v26, %v2278_v25  ;;  %v2323_v25 = vor.u32 %v2550_v22, %v2320_v24  ;;  %v2310_v26 = vld [vmem:[#allocation6 + $0x80] sm:$0xf]  ;;  %v2548_v28 = vld [vmem:[#allocation6 + $0x84] sm:$0xf] }
  0xf7   :  { %v1019_v46 = vadd.f32 %v1018_v30, %v1006_v6  ;;  %v2558_v30 = vld [vmem:[#allocation6 + $0xd4] sm:$0xf]  ;;  %v2311_v29 = vor.u32 %v2549_v27, %v2310_v26 }
  0xf8   :  { %v2355_v38 = vor.u32 %v2558_v30, %v2352_v34  ;;  %v2538_v6 = vld [vmem:[#allocation6 + $0x34] sm:$0xf]  ;;  %1549 = vmatpush.bf16.msrb.mxu1 %v2351_v37  ;;  %1537 = vmatpush.bf16.msrb.mxu0 %v2279_v57  ;;  %v2312_v30 = vld [vmem:[#allocation6 + $0x88] sm:$0xf0] }
  0xfa   :  { %1575 = vmatpush.bf16.msrb.mxu3 %v2355_v38 }
  0xfc   :  { %v1007_v43 = vpop.f32.mrf.mxu2 }
  0xfd   :  { %v1020_v44 = vpop.f32.mrf.mxu3  ;;  %v2344_v43 = vld [vmem:[#allocation6 + $0xc8] sm:$0xf0] }
  0xfe   :  { %v2283_v44 = vor.u32 %v2540_v32, %v2280_v33  ;;  %v2315_v32 = vor.u32 %v2548_v28, %v2312_v30  ;;  %v1112_v33 = vld [vmem:[%s2800_s4] sm:$0x3] }
  0xff   :  { %v1114_v34 = vperm.slane %v1112_v33, 0 }
 0x100   :  { %1563 = vmatpush.bf16.msrb.mxu2 %v2283_v44 }
 0x10c   :  { %v1031_v7 = vpop.f32.mrf.mxu0 }
 0x10d   :  { %v1044_v47 = vpop.f32.mrf.mxu1  ;;  %v1032_v48 = vadd.f32 %v1031_v7, %v1019_v46  ;;  %v2272_v46 = vld [vmem:[#allocation6 + $0x38] sm:$0xf0]  ;;  %v2343_v7 = vor.u32 %v2557_v41, %v2342_v39  ;;  %v1115_v39 = vperm.slane %v1112_v33, 1 }
 0x10f   :  { %v1045_v49 = vadd.f32 %v1044_v47, %v1032_v48  ;;  %v2347_v47 = vor.u32 %v2556_v42, %v2344_v43  ;;  %v2334_v48 = vld [vmem:[#allocation6 + $0xb0] sm:$0xf]  ;;  %1550 = vmatpush.bf16.msrb.mxu1 %v2343_v7 }
 0x111   :  { %1576 = vmatpush.bf16.msrb.mxu3 %v2347_v47  ;;  %v1368_v47 = vld [vmem:[%s2802_s6] sm:$0x3] }
 0x114   :  { %v1057_v50 = vpop.f32.mrf.mxu2  ;;  %v1033_v52 = vpop.f32.mrf.mxu0 }
 0x115   :  { %v1058_v51 = vadd.f32 %v1057_v50, %v1045_v49  ;;  %v1070_v35 = vpop.f32.mrf.mxu3  ;;  %v1046_v53 = vpop.f32.mrf.mxu1  ;;  %v2271_v49 = vor.u32 %v2539_v5, %v2270_v45  ;;  %v2555_v50 = vld [vmem:[#allocation6 + $0xb4] sm:$0xf0]  ;;  %v2275_v52 = vor.u32 %v2538_v6, %v2272_v46 }
 0x116   :  { %v2262_v53 = vld [vmem:[#allocation6 + $0x20] sm:$0xf] }
 0x117   :  { %v1071_v40 = vadd.f32 %v1070_v35, %v1058_v51  ;;  %v2554_v51 = vld [vmem:[#allocation6 + $0xb4] sm:$0xf]  ;;  %v2336_v35 = vld [vmem:[#allocation6 + $0xb8] sm:$0xf0]  ;;  %1538 = vmatpush.bf16.msrb.mxu0 %v2271_v49  ;;  %1564 = vmatpush.bf16.msrb.mxu2 %v2275_v52  ;;  %v1370_v49 = vperm.slane %v1368_v47, 0 }
 0x118   :  { %v2339_v55 = vor.u32 %v2554_v51, %v2336_v35 }
 0x119   :  { %v1075_v54 = vmax.f32 %v1071_v40, 0.0  ;;  %v2537_v40 = vld [vmem:[#allocation6 + $0x24] sm:$0xf0] }
 0x11a   :  { %v2263_v56 = vor.u32 %v2537_v40, %v2262_v53  ;;  %1577 = vmatpush.bf16.msrb.mxu3 %v2339_v55  ;;  %v1371_v53 = vperm.slane %v1368_v47, 1 }
 0x11b   :  { %1077 = vst [vmem:[%s2803_s7 + $0x8] sm:$0xff] %v1075_v54  ;;  %v1079_v17 = vpack.c.bf16 %v1075_v54, %v1075_v54  ;;  %v2536_v54 = vld [vmem:[#allocation6 + $0x24] sm:$0xf] }
 0x11c   :  { %v1059_v31 = vpop.f32.mrf.mxu2  ;;  %1539 = vmatpush.bf16.msrb.mxu0 %v2263_v56 }
 0x11d   :  { %v1072_v36 = vpop.f32.mrf.mxu3  ;;  %1299 = vmatmul.bf16.vlgmr.msra.gmra.mxu1 %v1079_v17  ;;  %1325 = vmatmul.bf16.vlgmr.msra.gmra.mxu3 %v1079_v17  ;;  %v2264_v17 = vld [vmem:[#allocation6 + $0x28] sm:$0xf0] }
 0x11e   :  { %v2335_v36 = vor.u32 %v2555_v50, %v2334_v48  ;;  %v2267_v58 = vor.u32 %v2536_v54, %v2264_v17  ;;  %1578 = vmatpush.bf16.msrb.mxu3 %v2331_v12 }
 0x120   :  { %1551 = vmatpush.bf16.msrb.mxu1 %v2335_v36  ;;  %1565 = vmatpush.bf16.msrb.mxu2 %v2267_v58 }
 0x121   :  { %1540 = vmatpush.bf16.msrb.mxu0 %v2255_v1 }
 0x122   :  { %1579 = vmatpush.bf16.msrb.mxu3 %v2323_v25 }
 0x124   :  { %1566 = vmatpush.bf16.msrb.mxu2 %v2259_v3  ;;  %1552 = vmatpush.bf16.msrb.mxu1 %v2327_v10 }
 0x125   :  { %1541 = vmatpush.bf16.msrb.mxu0 %v2247_v16 }
 0x126   :  { %1580 = vmatpush.bf16.msrb.mxu3 %v2315_v32 }
 0x128   :  { %1567 = vmatpush.bf16.msrb.mxu2 %v2251_v19  ;;  %1553 = vmatpush.bf16.msrb.mxu1 %v2319_v23 }
 0x12c   :  { %1554 = vmatpush.bf16.msrb.mxu1 %v2311_v29 }
 0x15a   :  { %v1287_v31 = vpop.f32.mrf.mxu0 }
 0x15b   :  { %v1288_v37 = vadd.f32 %v1287_v31, %v1114_v34 }
 0x160   :  { %v1313_v59 = vpop.f32.mrf.mxu2 }
 0x161   :  { %v1314_v42 = vadd.f32 %v1313_v59, %v1115_v39 }
 0x162   :  { %v1289_v60 = vpop.f32.mrf.mxu0 }
 0x168   :  { %v1315_v61 = vpop.f32.mrf.mxu2 }
 0x19a   :  { %v1300_v38 = vpop.f32.mrf.mxu1 }
 0x19b   :  { %v1301_v57 = vadd.f32 %v1300_v38, %v1288_v37 }
 0x19d   :  { %v1330_v41 = vmax.f32 %v1301_v57, 0.0 }
 0x19f   :  { %1332 = vst [vmem:[%s2804_s8] sm:$0xff] %v1330_v41  ;;  %v1334_v43 = vpack.c.bf16 %v1330_v41, %v1330_v41 }
 0x1a0   :  { %v1326_v44 = vpop.f32.mrf.mxu3 }
 0x1a1   :  { %v1327_v45 = vadd.f32 %v1326_v44, %v1314_v42  ;;  %1542 = vmatmul.bf16.vlgmr.msrb.gmra.mxu0 %v1334_v43  ;;  %1568 = vmatmul.bf16.vlgmr.msrb.gmra.mxu2 %v1334_v43 }
 0x1a2   :  { %v1302_v5 = vpop.f32.mrf.mxu1 }
 0x1a3   :  { %v1331_v6 = vmax.f32 %v1327_v45, 0.0 }
 0x1a5   :  { %1333 = vst [vmem:[%s2804_s8 + $0x8] sm:$0xff] %v1331_v6  ;;  %v1335_v46 = vpack.c.bf16 %v1331_v6, %v1331_v6 }
 0x1a7   :  { %1555 = vmatmul.bf16.vlgmr.msrb.gmra.mxu1 %v1335_v46  ;;  %1581 = vmatmul.bf16.vlgmr.msrb.gmra.mxu3 %v1335_v46 }
 0x1a8   :  { %v1328_v7 = vpop.f32.mrf.mxu3 }
 0x21e   :  { %v1543_v48 = vpop.f32.mrf.mxu0 }
 0x21f   :  { %v1544_v50 = vadd.f32 %v1543_v48, %v1370_v49 }
 0x224   :  { %v1556_v51 = vpop.f32.mrf.mxu1  ;;  %v1569_v35 = vpop.f32.mrf.mxu2 }
 0x225   :  { %v1557_v52 = vadd.f32 %v1556_v51, %v1544_v50  ;;  %v1570_v17 = vadd.f32 %v1569_v35, %v1371_v53 }
 0x226   :  { %v1545_v40 = vpop.f32.mrf.mxu0 }
 0x227   :  { %v1586_v54 = vmax.f32 %v1557_v52, 0.0 }
 0x229   :  { %1588 = vst [vmem:[%s2805_s9] sm:$0xff] %v1586_v54 }
 0x22a   :  { %v1582_v31 = vpop.f32.mrf.mxu3 }
 0x22b   :  { %v1583_v36 = vadd.f32 %v1582_v31, %v1570_v17 }
 0x22c   :  { %v1558_v55 = vpop.f32.mrf.mxu1  ;;  %v1571_v56 = vpop.f32.mrf.mxu2 }
 0x22d   :  { %v1587_v58 = vmax.f32 %v1583_v36, 0.0 }
 0x22f   :  { %1589 = vst [vmem:[%s2805_s9 + $0x8] sm:$0xff] %v1587_v58 }
 0x232   :  { %v1584_v59 = vpop.f32.mrf.mxu3 }
 0x233   :  { %1602 = vsyncpa [#allocation3], 1 }
 0x234   :  { %1603 = vsyncpa [#allocation5], 1 }

</bundles_post_ra>
